<compile_context>
chip_gen: v7x
topology: tpu7x:2x2x1
jax: 0.10.0
libtpu: 0.0.40
codegen_flags: <defaults>
</compile_context>

<pallas_src>
import math

import jax
import jax.numpy as jnp
from jax.experimental import pallas as pl
from jax.experimental.pallas import tpu as pltpu

_HALF_LOG_2PI = float(0.5 * math.log(2.0 * math.pi))


def _softplus(x):
    # stable softplus (log1p(exp(x)) overflows for large x)
    return jnp.maximum(x, 0.0) + jnp.log(1.0 + jnp.exp(-jnp.abs(x)))


def _round_up(n, m):
    return ((n + m - 1) // m) * m


def _choose_divisor(n, candidates):
    for t in candidates:
        if t <= n and n % t == 0:
            return t
    return n


def _choose_rows(total_rows, ncols, budget_bytes=8 << 20):
    """Largest sublane-aligned row tile whose double-buffered 2-array footprint fits."""
    max_rows = max(8, budget_bytes // (ncols * 4 * 2 * 2))
    for t in (1024, 512, 256, 128, 64, 32, 16, 8):
        if t <= max_rows and total_rows % t == 0:
            return t
    return total_rows


def _clamp_vmem(nbytes):
    # 1.5x headroom + 2 MiB, clamped to [16 MiB, 60 MiB] (v7x physical VMEM = 64 MiB).
    return int(min(60 << 20, max(16 << 20, int(nbytes * 1.5) + (2 << 20))))


# ---------------------------------------------------------------------------
# Kernel 1: per-(group, O-tile) combine of the weight hierarchy.
# Emits W_mean / W_var transposed to (I, O) layout and cast to bf16.
# ---------------------------------------------------------------------------
def _combine_kernel(gw_mu_ref, gw_rho_ref,      # (TO, I)
                    rw_mu_ref, rw_rho_ref,      # (1, TO, I)  group g
                    gb_mu_ref, gb_rho_ref,      # (1, TO)
                    rb_mu_ref, rb_rho_ref,      # (1, 1, TO)  group g
                    w_mean_ref, w_var_ref,      # (1, I, TO)  bf16
                    b_mean_ref, b_sig_ref):     # (1, 1, TO)  f32
    sgw = _softplus(gw_rho_ref[...])            # (TO, I) softplus on the EUP
    srw = _softplus(rw_rho_ref[0])              # (TO, I)
    w_mean = gw_mu_ref[...] + sgw * rw_mu_ref[0]
    w_sig = sgw * srw
    # transpose once per (group, o-tile) -> canonical (K, N) MXU layout, bf16.
    w_mean_ref[0] = w_mean.T.astype(jnp.bfloat16)
    w_var_ref[0] = (w_sig * w_sig).T.astype(jnp.bfloat16)
    sgb = _softplus(gb_rho_ref[...])            # (1, TO)
    srb = _softplus(rb_rho_ref[0])              # (1, TO)
    b_mean_ref[0] = gb_mu_ref[...] + sgb * rb_mu_ref[0]
    b_sig_ref[0] = sgb * srb


def _combine_groups(p, block_o=256):
    O, I = p["group_weight_mu"].shape
    G = p["raw_weight_mu"].shape[0]
    TO = _choose_divisor(O, (block_o, 256, 128))
    num_o = O // TO
    gb_mu = p["group_bias_mu"].reshape(1, O)
    gb_rho = p["group_bias_rho"].reshape(1, O)
    rb_mu = p["raw_bias_mu"].reshape(G, 1, O)
    rb_rho = p["raw_bias_rho"].reshape(G, 1, O)
    vmem = _clamp_vmem(2 * (4 * TO * I * 4 + 2 * I * TO * 2 + 6 * TO * 4))
    return pl.pallas_call(
        _combine_kernel,
        out_shape=(jax.ShapeDtypeStruct((G, I, O), jnp.bfloat16),
                   jax.ShapeDtypeStruct((G, I, O), jnp.bfloat16),
                   jax.ShapeDtypeStruct((G, 1, O), jnp.float32),
                   jax.ShapeDtypeStruct((G, 1, O), jnp.float32)),
        grid=(G, num_o),
        in_specs=[
            pl.BlockSpec((TO, I), lambda g, o: (o, 0)),
            pl.BlockSpec((TO, I), lambda g, o: (o, 0)),
            pl.BlockSpec((1, TO, I), lambda g, o: (g, o, 0)),
            pl.BlockSpec((1, TO, I), lambda g, o: (g, o, 0)),
            pl.BlockSpec((1, TO), lambda g, o: (0, o)),
            pl.BlockSpec((1, TO), lambda g, o: (0, o)),
            pl.BlockSpec((1, 1, TO), lambda g, o: (g, 0, o)),
            pl.BlockSpec((1, 1, TO), lambda g, o: (g, 0, o)),
        ],
        out_specs=(
            pl.BlockSpec((1, I, TO), lambda g, o: (g, 0, o)),
            pl.BlockSpec((1, I, TO), lambda g, o: (g, 0, o)),
            pl.BlockSpec((1, 1, TO), lambda g, o: (g, 0, o)),
            pl.BlockSpec((1, 1, TO), lambda g, o: (g, 0, o)),
        ),
        compiler_params=pltpu.CompilerParams(
            dimension_semantics=("parallel", "arbitrary"),
            vmem_limit_bytes=vmem),
    )(p["group_weight_mu"], p["group_weight_rho"],
      p["raw_weight_mu"], p["raw_weight_rho"],
      gb_mu, gb_rho, rb_mu, rb_rho)


# ---------------------------------------------------------------------------
# Kernel 2: forward.  grid = (o_tiles, batch_tiles); each batch tile maps to
# exactly one group (rows sorted + per-group padded), group taken from the
# scalar-prefetched per-tile table -> one matmul pair per tile, no masking.
# ---------------------------------------------------------------------------
def _hbl_fwd_kernel(tg_ref,        # SMEM: (num_tiles,) per-tile group id (unused in body)
                    x_ref,         # (TB, I)  f32 (padded, group-sorted)
                    zw_ref,        # (TB, TO) f32 weight-noise
                    zb_ref,        # (TB, TO) f32 bias-noise
                    ard_ref,       # (1, I)   f32
                    w_mean_ref,    # (1, I, TO) bf16
                    w_var_ref,     # (1, I, TO) bf16
                    b_mean_ref,    # (1, 1, TO) f32
                    b_sig_ref,     # (1, 1, TO) f32
                    out_ref):      # (TB, TO) f32
    del tg_ref
    xa = x_ref[...] * ard_ref[...]                   # dropout == identity (eval mode)
    mean = jnp.dot(xa.astype(jnp.bfloat16), w_mean_ref[0],
                   preferred_element_type=jnp.float32)          # (TB, TO)
    var = jnp.dot((xa * xa).astype(jnp.bfloat16), w_var_ref[0],
                  preferred_element_type=jnp.float32)           # (TB, TO) >= 0
    out_ref[...] = (mean + jnp.sqrt(var) * zw_ref[...]
                    + b_mean_ref[0] + b_sig_ref[0] * zb_ref[...])


# ---------------------------------------------------------------------------
# Kernel 3a/3b: KL reduction, tiled row chunks with a (1,1) resident accumulator.
# ---------------------------------------------------------------------------
def _kl_raw_kernel(rw_mu_ref, rw_rho_ref, out_ref):   # (TR, I), (TR, I) -> (1, 1)
    k = pl.program_id(0)

    @pl.when(k == 0)
    def _init():
        out_ref[...] = jnp.zeros_like(out_ref)

    s = _softplus(rw_rho_ref[...])
    mu = rw_mu_ref[...]
    indiv = jnp.sum(-_HALF_LOG_2PI - jnp.log(s) + 0.5 * (s * s + mu * mu) - 0.5)
    out_ref[...] += jnp.reshape(indiv, (1, 1))


def _kl_group_kernel(gw_mu_ref, gw_rho_ref,   # (TR, I) chunk of group weights
                     gb_rho_ref,              # (1, O)
                     ard_ref,                 # (1, I)
                     out_ref):                # (1, 1)
    k = pl.program_id(0)

    @pl.when(k == 0)
    def _init():
        gbs = _softplus(gb_rho_ref[...])      # HalfNormalHyperPrior(scale=1.0) on bias sigma
        lgb = jnp.log(gbs)
        hyper_b = jnp.sum(-_HALF_LOG_2PI - lgb + 0.5 * (lgb * lgb + gbs * gbs) - 0.5)
        out_ref[...] = jnp.reshape(hyper_b + jnp.sum(ard_ref[...]), (1, 1))

    s = _softplus(gw_rho_ref[...])
    mu = gw_mu_ref[...]
    ls = jnp.log(s)
    # HierarchicalNormalPrior group term (group_mu=0, group_logvar=0 -> var=1)
    group = -ls + 0.5 * (s * s + mu * mu) - 0.5
    # HalfNormalHyperPrior(scale=1.0) on the group weight sigma
    hyper = -_HALF_LOG_2PI - ls + 0.5 * (ls * ls + s * s) - 0.5
    out_ref[...] += jnp.reshape(jnp.sum(group + hyper), (1, 1))


def hbl_kl(p):
    O, I = p["group_weight_mu"].shape
    G = p["raw_weight_mu"].shape[0]
    GO = G * O

    TR = _choose_rows(GO, I)
    raw_kl = pl.pallas_call(
        _kl_raw_kernel,
        out_shape=jax.ShapeDtypeStruct((1, 1), jnp.float32),
        grid=(GO // TR,),
        in_specs=[pl.BlockSpec((TR, I), lambda k: (k, 0)),
                  pl.BlockSpec((TR, I), lambda k: (k, 0))],
        out_specs=pl.BlockSpec((1, 1), lambda k: (0, 0)),
        compiler_params=pltpu.CompilerParams(
            dimension_semantics=("arbitrary",),
            vmem_limit_bytes=_clamp_vmem(2 * 2 * TR * I * 4)),
    )(p["raw_weight_mu"].reshape(GO, I), p["raw_weight_rho"].reshape(GO, I))

    TRg = _choose_rows(O, I)
    grp_kl = pl.pallas_call(
        _kl_group_kernel,
        out_shape=jax.ShapeDtypeStruct((1, 1), jnp.float32),
        grid=(O // TRg,),
        in_specs=[pl.BlockSpec((TRg, I), lambda k: (k, 0)),
                  pl.BlockSpec((TRg, I), lambda k: (k, 0)),
                  pl.BlockSpec((1, O), lambda k: (0, 0)),
                  pl.BlockSpec((1, I), lambda k: (0, 0))],
        out_specs=pl.BlockSpec((1, 1), lambda k: (0, 0)),
        compiler_params=pltpu.CompilerParams(
            dimension_semantics=("arbitrary",),
            vmem_limit_bytes=_clamp_vmem(2 * (2 * TRg * I * 4 + (O + I) * 4))),
    )(p["group_weight_mu"], p["group_weight_rho"],
      p["group_bias_rho"].reshape(1, O), p["ard_alpha"].reshape(1, I))

    return raw_kl[0, 0] + grp_kl[0, 0]


# ---------------------------------------------------------------------------
# Forward wrapper: sort by group, pad each group to a TB multiple, scalar-prefetch
# the per-tile group table, then one MXU matmul pair per (o-tile, batch-tile).
# ---------------------------------------------------------------------------
def hbl_forward(params, x, group_ids, key=None, noise=None, block_b=256, block_o=512):
    """HierarchicalBayesianLinear.forward: x (B,I), group_ids (B,) -> ((B,O), kl)."""
    B, I = x.shape
    O, I2 = params["group_weight_mu"].shape
    assert I2 == I
    G = params["raw_weight_mu"].shape[0]

    if noise is None:
        k1, k2 = jax.random.split(key)
        zw = jax.random.normal(k1, (B, O), jnp.float32)
        zb = jax.random.normal(k2, (B, O), jnp.float32)
    else:
        zw, zb = noise

    # Per-group hierarchy combine -> bf16 (I, O)-layout weights, once per group.
    w_mean, w_var, b_mean, b_sig = _combine_groups(params)

    TB = min(block_b, _round_up(B, 8))
    TO = _choose_divisor(O, (block_o, 512, 256, 128))
    num_o = O // TO

    # ---- group-sorted, per-group-padded batch layout (layout plumbing in XLA) ----
    gid = group_ids.astype(jnp.int32)
    order = jnp.argsort(gid)                                           # groups contiguous
    counts = jnp.bincount(gid, length=G).astype(jnp.int32)             # (G,)
    padded_counts = ((counts + TB - 1) // TB) * TB                     # (G,) multiples of TB
    group_starts = jnp.concatenate(
        [jnp.zeros((1,), jnp.int32), jnp.cumsum(counts)[:-1].astype(jnp.int32)])
    padded_starts = jnp.concatenate(
        [jnp.zeros((1,), jnp.int32), jnp.cumsum(padded_counts)[:-1].astype(jnp.int32)])
    padded_ends = jnp.cumsum(padded_counts).astype(jnp.int32)

    gid_sorted = gid[order]
    rank = jnp.arange(B, dtype=jnp.int32) - group_starts[gid_sorted]
    dest = padded_starts[gid_sorted] + rank                            # sorted row -> padded row

    B_tot = _round_up(B, TB) + G * TB      # static upper bound on sum_g round_up(c_g, TB)
    num_tiles = B_tot // TB

    x_p = jnp.zeros((B_tot, I), jnp.float32).at[dest].set(x[order].astype(jnp.float32))
    zw_p = jnp.zeros((B_tot, O), jnp.float32).at[dest].set(zw[order].astype(jnp.float32))
    zb_p = jnp.zeros((B_tot, O), jnp.float32).at[dest].set(zb[order].astype(jnp.float32))

    tile_starts = jnp.arange(num_tiles, dtype=jnp.int32) * TB
    tile_gid = jnp.searchsorted(padded_ends, tile_starts, side="right")
    tile_gid = jnp.minimum(tile_gid, G - 1).astype(jnp.int32)          # padding tiles -> any valid g

    ard = params["ard_alpha"].reshape(1, I).astype(jnp.float32)

    vmem = _clamp_vmem(2 * (TB * I * 4            # x
                            + 2 * TB * TO * 4     # z_w, z_b
                            + I * 4               # ard
                            + 2 * I * TO * 2      # W_mean, W_var (bf16)
                            + 2 * TO * 4          # b_mean, b_sig
                            + TB * TO * 4))       # out

    out_padded = pl.pallas_call(
        _hbl_fwd_kernel,
        out_shape=jax.ShapeDtypeStruct((B_tot, O), jnp.float32),
        grid_spec=pltpu.PrefetchScalarGridSpec(
            num_scalar_prefetch=1,
            # batch tiles innermost: same-group consecutive tiles reuse the resident W
            # block (index unchanged -> no re-DMA); both axes parallel for megacore.
            grid=(num_o, num_tiles),
            in_specs=[
                pl.BlockSpec((TB, I), lambda o, b, tg: (b, 0)),            # x
                pl.BlockSpec((TB, TO), lambda o, b, tg: (b, o)),           # z_w
                pl.BlockSpec((TB, TO), lambda o, b, tg: (b, o)),           # z_b
                pl.BlockSpec((1, I), lambda o, b, tg: (0, 0)),             # ard_alpha
                pl.BlockSpec((1, I, TO), lambda o, b, tg: (tg[b], 0, o)),  # W_mean[g]
                pl.BlockSpec((1, I, TO), lambda o, b, tg: (tg[b], 0, o)),  # W_var[g]
                pl.BlockSpec((1, 1, TO), lambda o, b, tg: (tg[b], 0, o)),  # b_mean[g]
                pl.BlockSpec((1, 1, TO), lambda o, b, tg: (tg[b], 0, o)),  # b_sig[g]
            ],
            out_specs=pl.BlockSpec((TB, TO), lambda o, b, tg: (b, o)),
        ),
        compiler_params=pltpu.CompilerParams(
            dimension_semantics=("parallel", "parallel"),
            vmem_limit_bytes=vmem),
    )(tile_gid, x_p, zw_p, zb_p, ard, w_mean, w_var, b_mean, b_sig)

    # gather back to the original row order
    dest_for_orig = jnp.zeros((B,), jnp.int32).at[order].set(dest)
    out = jnp.take(out_padded, dest_for_orig, axis=0)
    return out, hbl_kl(params)


# ---------------------------------------------------------------------------
# Pure-JAX reference (same noise realization) for the self-check, plus init
# mirroring the module's reset_parameters().
# ---------------------------------------------------------------------------
def _reference_forward(p, x, group_ids, zw, zb):
    sgw = _softplus(p["group_weight_rho"])
    srw = _softplus(p["raw_weight_rho"])
    sgb = _softplus(p["group_bias_rho"])
    srb = _softplus(p["raw_bias_rho"])
    w_mean = p["group_weight_mu"][None] + sgw[None] * p["raw_weight_mu"]
    w_std = sgw[None] * srw
    b_mean = p["group_bias_mu"][None] + sgb[None] * p["raw_bias_mu"]
    b_std = sgb[None] * srb
    xa = x * p["ard_alpha"][None]
    mean = jnp.einsum("bi,boi->bo", xa, w_mean[group_ids])
    var = jnp.einsum("bi,boi->bo", xa * xa, (w_std ** 2)[group_ids])
    return mean + jnp.sqrt(var) * zw + b_mean[group_ids] + b_std[group_ids] * zb


def _reference_kl(p):
    gws = _softplus(p["group_weight_rho"])
    gbs = _softplus(p["group_bias_rho"])
    rws = _softplus(p["raw_weight_rho"])
    group_kl = jnp.sum(-jnp.log(gws) + 0.5 * (gws ** 2 + p["group_weight_mu"] ** 2) - 0.5)
    indiv_kl = jnp.sum(-_HALF_LOG_2PI - jnp.log(rws)
                       + 0.5 * (rws ** 2 + p["raw_weight_mu"] ** 2) - 0.5)

    def hn(s):
        ls = jnp.log(s)
        return jnp.sum(-_HALF_LOG_2PI - ls + 0.5 * (ls * ls + s * s) - 0.5)

    return group_kl + indiv_kl + hn(gws) + hn(gbs) + jnp.sum(p["ard_alpha"])


def init_hbl_params(key, in_f, out_f, num_groups):
    k = jax.random.split(key, 4)
    bw = 1.0 / math.sqrt(in_f)     # kaiming_uniform(a=sqrt(5)) bound
    return {
        "group_weight_mu": jax.random.uniform(k[0], (out_f, in_f), jnp.float32, -bw, bw),
        "group_weight_rho": jnp.full((out_f, in_f), -5.0, jnp.float32),
        "group_bias_mu": jax.random.uniform(k[1], (out_f,), jnp.float32, -0.1, 0.1),
        "group_bias_rho": jnp.full((out_f,), -5.0, jnp.float32),
        "raw_weight_mu": jax.random.uniform(k[2], (num_groups, out_f, in_f),
                                            jnp.float32, -bw, bw),
        "raw_weight_rho": jnp.full((num_groups, out_f, in_f), -5.0, jnp.float32),
        "raw_bias_mu": jax.random.uniform(k[3], (num_groups, out_f),
                                          jnp.float32, -0.1, 0.1),
        "raw_bias_rho": jnp.full((num_groups, out_f), -5.0, jnp.float32),
        "ard_alpha": jnp.ones((in_f,), jnp.float32),
    }


# ---------------------------------------------------------------------------

if __name__ == "__main__":
    key = jax.random.PRNGKey(0)
    batch, in_features, out_features, num_groups = 32, 128, 128, 3

    k_params, k_x, k_g, k_noise = jax.random.split(key, 4)
    params = init_hbl_params(k_params, in_features, out_features, num_groups)
    x = jax.random.normal(k_x, (batch, in_features), jnp.float32)
    group_ids = jax.random.randint(k_g, (batch,), 0, num_groups, dtype=jnp.int32)
    k_zw, k_zb = jax.random.split(k_noise)
    zw = jax.random.normal(k_zw, (batch, out_features), jnp.float32)
    zb = jax.random.normal(k_zb, (batch, out_features), jnp.float32)

    out, kl = hbl_forward(params, x, group_ids, noise=(zw, zb))
    out, kl = jax.block_until_ready((out, kl))

    assert out.shape == (batch, out_features) and out.dtype == jnp.float32
    assert kl.shape == () and kl.dtype == jnp.float32

    ref_out = _reference_forward(params, x, group_ids, zw, zb)
    ref_kl = _reference_kl(params)
    max_err = float(jnp.max(jnp.abs(out - ref_out)))
    assert jnp.allclose(out, ref_out, rtol=2e-2, atol=2e-2), max_err
    assert jnp.allclose(kl, ref_kl, rtol=1e-4, atol=1.0), (float(kl), float(ref_kl))

    print("KERNEL_OK")
</pallas_src>

<mosaic_0001>
module attributes {stable_mosaic.version = 11 : i64} {
  func.func @_combine_kernel(%arg0: i32, %arg1: i32, %arg2: memref<128x128xf32, #tpu.memory_space<vmem>>, %arg3: memref<128x128xf32, #tpu.memory_space<vmem>>, %arg4: memref<1x128x128xf32, #tpu.memory_space<vmem>>, %arg5: memref<1x128x128xf32, #tpu.memory_space<vmem>>, %arg6: memref<1x128xf32, #tpu.memory_space<vmem>>, %arg7: memref<1x128xf32, #tpu.memory_space<vmem>>, %arg8: memref<1x1x128xf32, #tpu.memory_space<vmem>>, %arg9: memref<1x1x128xf32, #tpu.memory_space<vmem>>, %arg10: memref<1x128x128xbf16, #tpu.memory_space<vmem>>, %arg11: memref<1x128x128xbf16, #tpu.memory_space<vmem>>, %arg12: memref<1x1x128xf32, #tpu.memory_space<vmem>>, %arg13: memref<1x1x128xf32, #tpu.memory_space<vmem>>) attributes {dimension_semantics = [#tpu.dimension_semantics<parallel>, #tpu.dimension_semantics<arbitrary>], iteration_bounds = array<i64: 3, 1>, scalar_prefetch = 0 : i64, scratch_operands = 0 : i64, tpu.core_type = #tpu.core_type<tc>, window_params = [{transform_indices = @transform_0, window_bounds = array<i64: 128, 128>}, {transform_indices = @transform_1, window_bounds = array<i64: 128, 128>}, {transform_indices = @transform_2, window_bounds = array<i64: 1, 128, 128>}, {transform_indices = @transform_3, window_bounds = array<i64: 1, 128, 128>}, {transform_indices = @transform_4, window_bounds = array<i64: 1, 128>}, {transform_indices = @transform_5, window_bounds = array<i64: 1, 128>}, {transform_indices = @transform_6, window_bounds = array<i64: 1, 1, 128>}, {transform_indices = @transform_7, window_bounds = array<i64: 1, 1, 128>}, {transform_indices = @transform_8, window_bounds = array<i64: 1, 128, 128>}, {transform_indices = @transform_9, window_bounds = array<i64: 1, 128, 128>}, {transform_indices = @transform_10, window_bounds = array<i64: 1, 1, 128>}, {transform_indices = @transform_11, window_bounds = array<i64: 1, 1, 128>}]} {
    %c0 = arith.constant 0 : index
    %c0_0 = arith.constant 0 : index
    %0 = vector.load %arg3[%c0, %c0_0] : memref<128x128xf32, #tpu.memory_space<vmem>>, vector<128x128xf32>
    %cst = arith.constant 0.000000e+00 : f32
    %1 = vector.broadcast %cst : f32 to vector<128x128xf32>
    %2 = arith.maximumf %0, %1 : vector<128x128xf32>
    %3 = math.absf %0 : vector<128x128xf32>
    %cst_1 = arith.constant 0.000000e+00 : f32
    %4 = vector.broadcast %cst_1 : f32 to vector<128x128xf32>
    %5 = arith.subf %4, %3 : vector<128x128xf32>
    %6 = math.exp %5 : vector<128x128xf32>
    %cst_2 = arith.constant 1.000000e+00 : f32
    %7 = vector.broadcast %cst_2 : f32 to vector<128x128xf32>
    %8 = arith.addf %7, %6 : vector<128x128xf32>
    %9 = math.log %8 : vector<128x128xf32>
    %10 = arith.addf %2, %9 : vector<128x128xf32>
    %c0_3 = arith.constant 0 : index
    %c0_4 = arith.constant 0 : index
    %c0_5 = arith.constant 0 : index
    %11 = vector.load %arg5[%c0_3, %c0_4, %c0_5] : memref<1x128x128xf32, #tpu.memory_space<vmem>>, vector<1x128x128xf32>
    %12 = vector.shape_cast %11 : vector<1x128x128xf32> to vector<128x128xf32>
    %cst_6 = arith.constant 0.000000e+00 : f32
    %13 = vector.broadcast %cst_6 : f32 to vector<128x128xf32>
    %14 = arith.maximumf %12, %13 : vector<128x128xf32>
    %15 = math.absf %12 : vector<128x128xf32>
    %cst_7 = arith.constant 0.000000e+00 : f32
    %16 = vector.broadcast %cst_7 : f32 to vector<128x128xf32>
    %17 = arith.subf %16, %15 : vector<128x128xf32>
    %18 = math.exp %17 : vector<128x128xf32>
    %cst_8 = arith.constant 1.000000e+00 : f32
    %19 = vector.broadcast %cst_8 : f32 to vector<128x128xf32>
    %20 = arith.addf %19, %18 : vector<128x128xf32>
    %21 = math.log %20 : vector<128x128xf32>
    %22 = arith.addf %14, %21 : vector<128x128xf32>
    %c0_9 = arith.constant 0 : index
    %c0_10 = arith.constant 0 : index
    %23 = vector.load %arg2[%c0_9, %c0_10] : memref<128x128xf32, #tpu.memory_space<vmem>>, vector<128x128xf32>
    %c0_11 = arith.constant 0 : index
    %c0_12 = arith.constant 0 : index
    %c0_13 = arith.constant 0 : index
    %24 = vector.load %arg4[%c0_11, %c0_12, %c0_13] : memref<1x128x128xf32, #tpu.memory_space<vmem>>, vector<1x128x128xf32>
    %25 = vector.shape_cast %24 : vector<1x128x128xf32> to vector<128x128xf32>
    %26 = arith.mulf %10, %25 : vector<128x128xf32>
    %27 = arith.addf %23, %26 : vector<128x128xf32>
    %28 = arith.mulf %10, %22 : vector<128x128xf32>
    %29 = tpu.transpose %27, [1, 0] : vector<128x128xf32> -> vector<128x128xf32>
    %30 = arith.truncf %29 : vector<128x128xf32> to vector<128x128xbf16>
    %c0_14 = arith.constant 0 : index
    %c0_15 = arith.constant 0 : index
    %c0_16 = arith.constant 0 : index
    %31 = vector.load %arg10[%c0_14, %c0_15, %c0_16] : memref<1x128x128xbf16, #tpu.memory_space<vmem>>, vector<1x128x128xbf16>
    %32 = vector.shape_cast %31 : vector<1x128x128xbf16> to vector<128x128xbf16>
    %33 = vector.shape_cast %30 : vector<128x128xbf16> to vector<1x128x128xbf16>
    tpu.vector_store %arg10[%c0_14, %c0_15, %c0_16], %33 {strides = array<i32>} : memref<1x128x128xbf16, #tpu.memory_space<vmem>>, vector<1x128x128xbf16>,
    %34 = arith.mulf %28, %28 : vector<128x128xf32>
    %35 = tpu.transpose %34, [1, 0] : vector<128x128xf32> -> vector<128x128xf32>
    %36 = arith.truncf %35 : vector<128x128xf32> to vector<128x128xbf16>
    %c0_17 = arith.constant 0 : index
    %c0_18 = arith.constant 0 : index
    %c0_19 = arith.constant 0 : index
    %37 = vector.load %arg11[%c0_17, %c0_18, %c0_19] : memref<1x128x128xbf16, #tpu.memory_space<vmem>>, vector<1x128x128xbf16>
    %38 = vector.shape_cast %37 : vector<1x128x128xbf16> to vector<128x128xbf16>
    %39 = vector.shape_cast %36 : vector<128x128xbf16> to vector<1x128x128xbf16>
    tpu.vector_store %arg11[%c0_17, %c0_18, %c0_19], %39 {strides = array<i32>} : memref<1x128x128xbf16, #tpu.memory_space<vmem>>, vector<1x128x128xbf16>,
    %c0_20 = arith.constant 0 : index
    %c0_21 = arith.constant 0 : index
    %40 = vector.load %arg7[%c0_20, %c0_21] : memref<1x128xf32, #tpu.memory_space<vmem>>, vector<1x128xf32>
    %cst_22 = arith.constant 0.000000e+00 : f32
    %41 = vector.broadcast %cst_22 : f32 to vector<1x128xf32>
    %42 = arith.maximumf %40, %41 : vector<1x128xf32>
    %43 = math.absf %40 : vector<1x128xf32>
    %cst_23 = arith.constant 0.000000e+00 : f32
    %44 = vector.broadcast %cst_23 : f32 to vector<1x128xf32>
    %45 = arith.subf %44, %43 : vector<1x128xf32>
    %46 = math.exp %45 : vector<1x128xf32>
    %cst_24 = arith.constant 1.000000e+00 : f32
    %47 = vector.broadcast %cst_24 : f32 to vector<1x128xf32>
    %48 = arith.addf %47, %46 : vector<1x128xf32>
    %49 = math.log %48 : vector<1x128xf32>
    %50 = arith.addf %42, %49 : vector<1x128xf32>
    %c0_25 = arith.constant 0 : index
    %c0_26 = arith.constant 0 : index
    %c0_27 = arith.constant 0 : index
    %51 = vector.load %arg9[%c0_25, %c0_26, %c0_27] : memref<1x1x128xf32, #tpu.memory_space<vmem>>, vector<1x1x128xf32>
    %52 = vector.shape_cast %51 : vector<1x1x128xf32> to vector<1x128xf32>
    %cst_28 = arith.constant 0.000000e+00 : f32
    %53 = vector.broadcast %cst_28 : f32 to vector<1x128xf32>
    %54 = arith.maximumf %52, %53 : vector<1x128xf32>
    %55 = math.absf %52 : vector<1x128xf32>
    %cst_29 = arith.constant 0.000000e+00 : f32
    %56 = vector.broadcast %cst_29 : f32 to vector<1x128xf32>
    %57 = arith.subf %56, %55 : vector<1x128xf32>
    %58 = math.exp %57 : vector<1x128xf32>
    %cst_30 = arith.constant 1.000000e+00 : f32
    %59 = vector.broadcast %cst_30 : f32 to vector<1x128xf32>
    %60 = arith.addf %59, %58 : vector<1x128xf32>
    %61 = math.log %60 : vector<1x128xf32>
    %62 = arith.addf %54, %61 : vector<1x128xf32>
    %c0_31 = arith.constant 0 : index
    %c0_32 = arith.constant 0 : index
    %63 = vector.load %arg6[%c0_31, %c0_32] : memref<1x128xf32, #tpu.memory_space<vmem>>, vector<1x128xf32>
    %c0_33 = arith.constant 0 : index
    %c0_34 = arith.constant 0 : index
    %c0_35 = arith.constant 0 : index
    %64 = vector.load %arg8[%c0_33, %c0_34, %c0_35] : memref<1x1x128xf32, #tpu.memory_space<vmem>>, vector<1x1x128xf32>
    %65 = vector.shape_cast %64 : vector<1x1x128xf32> to vector<1x128xf32>
    %66 = arith.mulf %50, %65 : vector<1x128xf32>
    %67 = arith.addf %63, %66 : vector<1x128xf32>
    %c0_36 = arith.constant 0 : index
    %c0_37 = arith.constant 0 : index
    %c0_38 = arith.constant 0 : index
    %68 = vector.load %arg12[%c0_36, %c0_37, %c0_38] : memref<1x1x128xf32, #tpu.memory_space<vmem>>, vector<1x1x128xf32>
    %69 = vector.shape_cast %68 : vector<1x1x128xf32> to vector<1x128xf32>
    %70 = vector.shape_cast %67 : vector<1x128xf32> to vector<1x1x128xf32>
    tpu.vector_store %arg12[%c0_36, %c0_37, %c0_38], %70 {strides = array<i32>} : memref<1x1x128xf32, #tpu.memory_space<vmem>>, vector<1x1x128xf32>,
    %71 = arith.mulf %50, %62 : vector<1x128xf32>
    %c0_39 = arith.constant 0 : index
    %c0_40 = arith.constant 0 : index
    %c0_41 = arith.constant 0 : index
    %72 = vector.load %arg13[%c0_39, %c0_40, %c0_41] : memref<1x1x128xf32, #tpu.memory_space<vmem>>, vector<1x1x128xf32>
    %73 = vector.shape_cast %72 : vector<1x1x128xf32> to vector<1x128xf32>
    %74 = vector.shape_cast %71 : vector<1x128xf32> to vector<1x1x128xf32>
    tpu.vector_store %arg13[%c0_39, %c0_40, %c0_41], %74 {strides = array<i32>} : memref<1x1x128xf32, #tpu.memory_space<vmem>>, vector<1x1x128xf32>,
    return
  }
  func.func @transform_0(%arg0: i32, %arg1: i32) -> (i32, i32) {
    %c0_i32 = arith.constant 0 : i32
    %c0_i32_0 = arith.constant 0 : i32
    return %arg1, %c0_i32 : i32, i32
  }
  func.func @transform_1(%arg0: i32, %arg1: i32) -> (i32, i32) {
    %c0_i32 = arith.constant 0 : i32
    %c0_i32_0 = arith.constant 0 : i32
    return %arg1, %c0_i32 : i32, i32
  }
  func.func @transform_2(%arg0: i32, %arg1: i32) -> (i32, i32, i32) {
    %c0_i32 = arith.constant 0 : i32
    %c0_i32_0 = arith.constant 0 : i32
    return %arg0, %arg1, %c0_i32 : i32, i32, i32
  }
  func.func @transform_3(%arg0: i32, %arg1: i32) -> (i32, i32, i32) {
    %c0_i32 = arith.constant 0 : i32
    %c0_i32_0 = arith.constant 0 : i32
    return %arg0, %arg1, %c0_i32 : i32, i32, i32
  }
  func.func @transform_4(%arg0: i32, %arg1: i32) -> (i32, i32) {
    %c0_i32 = arith.constant 0 : i32
    %c0_i32_0 = arith.constant 0 : i32
    return %c0_i32, %arg1 : i32, i32
  }
  func.func @transform_5(%arg0: i32, %arg1: i32) -> (i32, i32) {
    %c0_i32 = arith.constant 0 : i32
    %c0_i32_0 = arith.constant 0 : i32
    return %c0_i32, %arg1 : i32, i32
  }
  func.func @transform_6(%arg0: i32, %arg1: i32) -> (i32, i32, i32) {
    %c0_i32 = arith.constant 0 : i32
    %c0_i32_0 = arith.constant 0 : i32
    return %arg0, %c0_i32, %arg1 : i32, i32, i32
  }
  func.func @transform_7(%arg0: i32, %arg1: i32) -> (i32, i32, i32) {
    %c0_i32 = arith.constant 0 : i32
    %c0_i32_0 = arith.constant 0 : i32
    return %arg0, %c0_i32, %arg1 : i32, i32, i32
  }
  func.func @transform_8(%arg0: i32, %arg1: i32) -> (i32, i32, i32) {
    %c0_i32 = arith.constant 0 : i32
    %c0_i32_0 = arith.constant 0 : i32
    return %arg0, %c0_i32, %arg1 : i32, i32, i32
  }
  func.func @transform_9(%arg0: i32, %arg1: i32) -> (i32, i32, i32) {
    %c0_i32 = arith.constant 0 : i32
    %c0_i32_0 = arith.constant 0 : i32
    return %arg0, %c0_i32, %arg1 : i32, i32, i32
  }
  func.func @transform_10(%arg0: i32, %arg1: i32) -> (i32, i32, i32) {
    %c0_i32 = arith.constant 0 : i32
    %c0_i32_0 = arith.constant 0 : i32
    return %arg0, %c0_i32, %arg1 : i32, i32, i32
  }
  func.func @transform_11(%arg0: i32, %arg1: i32) -> (i32, i32, i32) {
    %c0_i32 = arith.constant 0 : i32
    %c0_i32_0 = arith.constant 0 : i32
    return %arg0, %c0_i32, %arg1 : i32, i32, i32
  }
}

</mosaic_0001>

<bundles_post_ra>
// kernel: tpu_custom_call.1
= control target key start
LH: loop header
LB: loop body
LE: loop exit
PB: predicated region body
PF: predicated region fallthrough
CT: control target
= control target key end

     0   :  { %s3222_s0 = inlined_call_operand.hbm [shape: f32[128,128], index: 0, kind: input, shape index: {}]   ;;  %s3223_s1 = inlined_call_operand.hbm [shape: f32[128,128], index: 1, kind: input, shape index: {}]   ;;  %s3224_s2 = inlined_call_operand.hbm [shape: f32[3,128,128], index: 2, kind: input, shape index: {}]   ;;  %s3225_s3 = inlined_call_operand.hbm [shape: f32[3,128,128], index: 3, kind: input, shape index: {}]   ;;  %s3226_s4 = inlined_call_operand.vmem [shape: f32[1,128], index: 4, kind: input, shape index: {}]   ;;  %s3227_s5 = inlined_call_operand.vmem [shape: f32[1,128], index: 5, kind: input, shape index: {}]   ;;  %s3228_s6 = inlined_call_operand.vmem [shape: f32[3,1,128], index: 6, kind: input, shape index: {}]   ;;  %s3229_s7 = inlined_call_operand.vmem [shape: f32[3,1,128], index: 7, kind: input, shape index: {}]   ;;  %s3230_s8 = inlined_call_operand.hbm [shape: bf16[3,128,128], index: 8, kind: output, shape index: {0}]   ;;  %s3231_s9 = inlined_call_operand.hbm [shape: bf16[3,128,128], index: 9, kind: output, shape index: {1}]   ;;  %s3232_s10 = inlined_call_operand.hbm [shape: f32[3,1,128], index: 10, kind: output, shape index: {2}]   ;;  %s3233_s11 = inlined_call_operand.hbm [shape: f32[3,1,128], index: 11, kind: output, shape index: {3}]  }
   0x1   :  { %3253 = sst [smem:[#allocation27_spill]] %s3222_s0 }
   0x2   :  { %3254 = sst [smem:[#allocation28_spill]] %s3224_s2 }
   0x3   :  { %3255 = sst [smem:[#allocation29_spill]] %s3226_s4 }
   0x4   :  { %3256 = sst [smem:[#allocation30_spill]] %s3228_s6 }
   0x5   :  { %3257 = sst [smem:[#allocation31_spill]] %s3229_s7 }
   0x6   :  { %3258 = sst [smem:[#allocation32_spill]] %s3230_s8 }
   0x7   :  { %3259 = sst [smem:[#allocation33_spill]] %s3231_s9 }
   0x8   :  { %3260 = sst [smem:[#allocation34_spill]] %s3232_s10 }
   0x9   :  { %3261 = sst [smem:[#allocation35_spill]] %s3233_s11 }
   0xa   :  { %17 = vsyncpa [#allocation3], 0 }
   0xb   :  { %18 = vsyncpa [#allocation6], 0 }
   0xc   :  { %19 = vsyncpa [#allocation4], 0 }
   0xd   :  { %21 = vsyncpa [#allocation4 + $0x1], 0 }
   0xe   :  { %22 = vsyncpa [#allocation11], 0 }
   0xf   :  { %24 = vsyncpa [#allocation11 + $0x1], 0 }
  0x10   :  { %25 = vsyncpa [#allocation14], 0 }
  0x11   :  { %27 = vsyncpa [#allocation14 + $0x1], 0  ;;  %s2550_s17 = smov 0   ;;  %s2552_s18 = smov 0  }
  0x12   :  { %s2554_s19 = smov 0   ;;  %s2556_s20 = smov 0  }
  0x13   :  { %s2558_s21 = smov 0   ;;  %s2560_s22 = smov 0  }
  0x14 LB: > { %3262 = sst [smem:[#allocation21_spill]] %s2456_s17  ;;  %s2581_s23 = sadd.s32 4294967295, %s2476_s22   ;;  %s2476_s22 = sphi %s2560_s22, %s33_s22   ;;  %s2472_s21 = sphi %s2558_s21, %s3310_s21   ;;  %s2468_s20 = sphi %s2556_s20, %s3309_s20   ;;  %s2464_s19 = sphi %s2554_s19, %s3305_s19   ;;  %s2460_s18 = sphi %s2552_s18, %s3308_s18   ;;  %s2456_s17 = sphi %s2550_s17, %s3307_s17  }
  0x15   : > { %3263 = sst [smem:[#allocation22_spill]] %s2464_s19  ;;  %s3234_s24 = sadd.s32 4294967294, %s2476_s22  }
  0x16   : > { %p113_p0 = scmp.ne.s32.totalorder %s2464_s19, %s2460_s18  ;;  %p114_p1 = scmp.eq.s32.totalorder %s2476_s22, 0 }
  0x17   : > { %p119_p2 = scmp.ne.s32.totalorder %s2460_s18, %s2456_s17  ;;  %p3239_p3 = scmp.eq.s32.totalorder %s2581_s23, 0 }
  0x18   : > { %p281_p4 = scmp.eq.s32.totalorder %s2581_s23, 2  ;;  %p2592_p5 = por %p114_p1, %p113_p0 }
  0x19   : > { %p287_p6 = scmp.eq.s32.totalorder %s3234_s24, 2  ;;  %p2600_p7 = por %p3239_p3, %p119_p2 }
  0x1a   : > { %p2604_p8 = por %p281_p4, %p113_p0  ;;  %p1632_p10 = scmp.ge.s32.totalorder %s2476_s22, 1 }
  0x1b   : > { %s3265_s27 = scalar_select %p2600_p7, 1, 0 }
  0x1c   : > { %s3266_s28 = scalar_select %p2604_p8, 1, 0 }
  0x1d   : > { %p2608_p9 = por %p287_p6, %p119_p2  ;;  %p378_p11 = scmp.lt.s32.totalorder %s2476_s22, 4 }
  0x1e   : > { %3267 = sst [smem:[#allocation23_spill]] %s3266_s28  ;;  %s2478_s12 = smov [#allocation2]  }
  0x1f   : > { %s3268_s29 = scalar_select %p2608_p9, 1, 0 }
  0x20   : > { %p2614_p12 = pnand %p1632_p10, %p378_p11  ;;  %s393_s13 = sshll.u32 %s2478_s12, 4  ;;  %s2618_s13 = int_to_ptr.vmem [resolvable:$true] %s393_s13 }
  0x21   : > { %3269 = sst [smem:[#allocation24_spill]] %s3268_s29  ;;  %p1872_p0 = scmp.lt.s32.totalorder %s2476_s22, 3 }
  0x22   : > { %s3270_s30 = scalar_select %p2614_p12, 1, 0 }
  0x23   : > { %p1843_p13 = pneg %p2614_p12  ;;  %p2631_p2 = pnand %p1872_p0, %p2592_p5 }
  0x24   : > { %s45_s16 = sadd.s32 1, %s2472_s21  ;;  %s3274_s0 = sld [smem:[#allocation27_spill]] }
  0x25   : > { %p2625_p1 = pnand %p1843_p13, %p3239_p3  ;;  %p2636_p4 = scmp.ge.s32.totalorder %s45_s16, 3 }
  0x26   : > { %s3272_s15 = scalar_select %p2631_p2, 1, 0 }
  0x27   : > { %p3247_p10 = pneg %p2625_p1 }
  0x2a   : > { %s2178_s29 = scalar_lea.hbm %s3274_s0, 2048 }
  0x2b   : > { %p2179_p6 = scmp.ne.s32.totalorder %s3274_s0, %s2178_s29  ;;  %p2185_p13 = scmp.lt.u32.totalorder %s2178_s29, %s3274_s0 }
  0x2d   : > { %p2181_p5 = pnand %p3247_p10, %p2179_p6 }
  0x2f   : > { %p2182_p11 = pneg %p2181_p5 }
  0x31   : > { %p2187_p0 = pnand %p2185_p13, %p2182_p11 }
  0x33   : > { %2190 = shalt.err (!%p2187_p0)
}
  0x34   : > { %s2191_s24 = scalar_lea.vmem %s2618_s13, 2048  ;;  %p2199_p7 = scmp.lt.s32.totalorder %s2618_s13, %s2618_s13 }
  0x35   : > { %p2192_p3 = scmp.ne.s32.totalorder %s2618_s13, %s2191_s24  ;;  %p2200_p6 = scmp.lt.s32.totalorder %s2191_s24, %s2191_s24 }
  0x37   : > { %p2194_p9 = pnand %p2192_p3, %p3247_p10  ;;  %p2201_p5 = por %p2200_p6, %p2199_p7 }
  0x39   : > { %p2195_p8 = pneg %p2194_p9 }
  0x3b   : > { %p2202_p12 = pnand %p2201_p5, %p2195_p8 }
  0x3d   : > { %2205 = shalt.err (!%p2202_p12)
}
  0x3e   : > { %s2479_s8 = smov 128   ;;  %s2480_s10 = smov 8  }
  0x3f   : > { %1846 = dma.hbm_to_vmem [thread:$0]  (!%p2625_p1), %s3274_s0, 2048, %s2618_s13, [#allocation3], %s2479_s8, %s2479_s8, %s2480_s10  }
  0x40   : > { %s435_s29 = sand.u32 1, %s2476_s22   ;;  %s3312_s16 = smov (%p2636_p4, %s45_s16), 0 }
  0x41   : > { %3275 = sst [smem:[#allocation25_spill]] %s3312_s16  ;;  %s437_s26 = sand.u32 1, %s2464_s19  }
  0x42   : > { %s101_s24 = ssub.s32 %s2472_s21, %s3312_s16  ;;  %s2678_s9 = sshll.u32 %s437_s26, 7 }
  0x43   : > { %p104_p3 = scmp.eq.s32.totalorder %s101_s24, 0  ;;  %s1693_s11 = sshll.u32 %s2472_s21, 11 }
  0x44   : > { %s439_s28 = scalar_lea.vmem [#allocation7], %s2678_s9  ;;  %s3276_s6 = sadd.s32 1, %s2464_s19 }
  0x45   : > { %s448_s4 = sshll.u32 %s439_s28, 4  ;;  %s3278_s2 = sld [smem:[#allocation28_spill]]  ;;  %s2694_s4 = int_to_ptr.vmem [resolvable:$true] %s448_s4 }
  0x46   : > { %s2685_s7 = scalar_select %p104_p3, %s2464_s19, %s3276_s6  }
  0x47   : > { %s2696_s25 = scalar_lea.sflag [#allocation3], %s435_s29  ;;  %p3250_p8 = pneg %p2631_p2 }
  0x48   : > { %3277 = sst [smem:[#allocation26_spill]] %s2685_s7 }
  0x4b   : > { %s2692_s12 = scalar_lea.hbm %s3278_s2, %s1693_s11  ;;  %s2211_s24 = scalar_lea.hbm %s3278_s2, 6144 }
  0x4c   : > { %s2206_s26 = scalar_lea.hbm %s2692_s12, 2048  ;;  %p2212_p4 = scmp.lt.u32.totalorder %s2692_s12, %s3278_s2 }
  0x4d   : > { %p2207_p7 = scmp.ne.s32.totalorder %s2692_s12, %s2206_s26  ;;  %p2213_p11 = scmp.lt.u32.totalorder %s2211_s24, %s2206_s26 }
  0x4e   : > { %p2215_p0 = scmp.lt.u32.totalorder %s2206_s26, %s2692_s12 }
  0x4f   : > { %p2209_p9 = pnand %p3250_p8, %p2207_p7  ;;  %p2214_p13 = por %p2213_p11, %p2212_p4 }
  0x51   : > { %p2210_p12 = pneg %p2209_p9  ;;  %p2216_p6 = por %p2215_p0, %p2214_p13 }
  0x53   : > { %p2217_p5 = pnand %p2216_p6, %p2210_p12 }
  0x55   : > { %2220 = shalt.err (!%p2217_p5)
}
  0x56   : > { %s2221_s29 = scalar_lea.vmem %s2694_s4, 2048  ;;  %s2481_s6 = smov [#allocation7]  }
  0x57   : > { %p2222_p3 = scmp.ne.s32.totalorder %s2694_s4, %s2221_s29  ;;  %s2226_s28 = sshll.u32 %s2481_s6, 4  ;;  %s2227_s28 = int_to_ptr.vmem [resolvable:$false] %s2226_s28 }
  0x58   : > { %s2228_s13 = scalar_lea.vmem %s2227_s28, 4096  ;;  %p2229_p10 = scmp.lt.s32.totalorder %s2694_s4, %s2227_s28 }
  0x59   : > { %p2224_p7 = pnand %p2222_p3, %p3250_p8  ;;  %p2230_p4 = scmp.lt.s32.totalorder %s2228_s13, %s2221_s29 }
  0x5b   : > { %p2225_p9 = pneg %p2224_p7  ;;  %p2231_p11 = por %p2230_p4, %p2229_p10 }
  0x5d   : > { %p2232_p13 = pnand %p2231_p11, %p2225_p9 }
  0x5f   : > { %2235 = shalt.err (!%p2232_p13)
}
  0x60   : > { %1853 = dma.hbm_to_vmem [thread:$0]  (!%p2631_p2), %s2692_s12, 2048, %s2694_s4, %s2696_s25, %s2479_s8, %s2479_s8, %s2480_s10  }
  0x61   : > { %s2482_s26 = smov [#allocation5]   ;;  %s2732_s6 = scalar_lea.hbm %s3225_s3, %s1693_s11 }
  0x62   : > { %s409_s24 = sshll.u32 %s2482_s26, 4  ;;  %s462_s28 = scalar_lea.vmem [#allocation8], %s2678_s9  ;;  %s410_s24 = int_to_ptr.vmem [resolvable:$true] %s409_s24 }
  0x63   : > { %s471_s13 = sshll.u32 %s462_s28, 4  ;;  %s2236_s16 = scalar_lea.hbm %s3223_s1, 2048  ;;  %s2758_s13 = int_to_ptr.vmem [resolvable:$true] %s471_s13 }
  0x64   : > { %p2237_p10 = scmp.ne.s32.totalorder %s3223_s1, %s2236_s16  ;;  %p3279_p12 = pneg %p2625_p1 }
  0x65   : > { %p2243_p5 = scmp.lt.u32.totalorder %s2236_s16, %s3223_s1 }
  0x66   : > { %p2239_p0 = pnand %p2237_p10, %p3279_p12 }
  0x68   : > { %p2240_p6 = pneg %p2239_p0 }
  0x6a   : > { %p2245_p3 = pnand %p2243_p5, %p2240_p6 }
  0x6c   : > { %2248 = shalt.err (!%p2245_p3)
}
  0x6d   : > { %s2249_s9 = scalar_lea.vmem %s410_s24, 2048  ;;  %p3280_p9 = pmov %p3279_p12 }
  0x6e   : > { %p2250_p7 = scmp.ne.s32.totalorder %s410_s24, %s2249_s9  ;;  %p2257_p13 = scmp.lt.s32.totalorder %s410_s24, %s410_s24 }
  0x6f   : > { %p2258_p8 = scmp.lt.s32.totalorder %s2249_s9, %s2249_s9 }
  0x70   : > { %p2252_p4 = pnand %p2250_p7, %p3280_p9 }
  0x71   : > { %p2259_p2 = por %p2258_p8, %p2257_p13 }
  0x72   : > { %p2253_p11 = pneg %p2252_p4 }
  0x74   : > { %p2260_p10 = pnand %p2259_p2, %p2253_p11 }
  0x76   : > { %2263 = shalt.err (!%p2260_p10)
}
  0x77   : > { %1849 = dma.hbm_to_vmem [thread:$0]  (!%p2625_p1), %s3223_s1, 2048, %s410_s24, [#allocation6], %s2479_s8, %s2479_s8, %s2480_s10  }
  0x78   : > { %s2264_s7 = scalar_lea.hbm %s2732_s6, 2048  ;;  %p3281_p2 = scmp.ne.s32.totalorder %s3272_s15, 0 }
  0x79   : > { %p2265_p8 = scmp.ne.s32.totalorder %s2732_s6, %s2264_s7  ;;  %s2269_s14 = scalar_lea.hbm %s3225_s3, 6144 }
  0x7a   : > { %p3282_p12 = pneg %p3281_p2  ;;  %p2270_p5 = scmp.lt.u32.totalorder %s2732_s6, %s3225_s3 }
  0x7b   : > { %p2271_p3 = scmp.lt.u32.totalorder %s2269_s14, %s2264_s7  ;;  %p2273_p9 = scmp.lt.u32.totalorder %s2264_s7, %s2732_s6 }
  0x7c   : > { %p2267_p0 = pnand %p2265_p8, %p3282_p12 }
  0x7d   : > { %p2272_p7 = por %p2271_p3, %p2270_p5 }
  0x7e   : > { %p2268_p6 = pneg %p2267_p0 }
  0x7f   : > { %p2274_p1 = por %p2273_p9, %p2272_p7 }
  0x81   : > { %p2275_p4 = pnand %p2274_p1, %p2268_p6 }
  0x83   : > { %2278 = shalt.err (!%p2275_p4)
}
  0x84   : > { %s2279_s24 = scalar_lea.vmem %s2758_s13, 2048  ;;  %p3283_p13 = pmov %p3282_p12 }
  0x85   : > { %p2280_p11 = scmp.ne.s32.totalorder %s2758_s13, %s2279_s24  ;;  %s2483_s17 = smov [#allocation8]  }
  0x86   : > { %s2284_s29 = sshll.u32 %s2483_s17, 4  ;;  %s2285_s29 = int_to_ptr.vmem [resolvable:$false] %s2284_s29 }
  0x87   : > { %p2282_p10 = pnand %p2280_p11, %p3283_p13  ;;  %s2286_s28 = scalar_lea.vmem %s2285_s29, 4096 }
  0x88   : > { %p2287_p12 = scmp.lt.s32.totalorder %s2758_s13, %s2285_s29  ;;  %p2288_p0 = scmp.lt.s32.totalorder %s2286_s28, %s2279_s24 }
  0x89   : > { %p2283_p8 = pneg %p2282_p10 }
  0x8a   : > { %p2289_p5 = por %p2288_p0, %p2287_p12 }
  0x8c   : > { %p2290_p3 = pnand %p2289_p5, %p2283_p8 }
  0x8e   : > { %2293 = shalt.err (!%p2290_p3)
}
  0x8f   : > { %1856 = dma.hbm_to_vmem [thread:$0]  (!%p3281_p2), %s2732_s6, 2048, %s2758_s13, %s2696_s25, %s2479_s8, %s2479_s8, %s2480_s10  }
  0x90   : > { %p3284_p6 = scmp.ne.s32.totalorder %s3270_s30, 0 }
  0x91   : > { %p3285_p7 = scmp.eq.s32.totalorder (!%p3284_p6), %s2581_s23, 0 }
  0x92   : > { %501 = sbr.rel (%p3284_p6) target bundleno = 476 (0x1dc), region = 52 }
  0x99   : > { %2431 = dma.done.wait (%p3285_p7), [#allocation3], 2048   ;;  %p3286_p9 = pmov %p3285_p7 }
  0x9a   : > { %p3287_p1 = pmov %p3285_p7 }
  0x9b   : > { %2433 = vsyncadd (%p3286_p9), [#allocation3], 4294965248 }
  0x9c   : > { %2435 = dma.done.wait (%p3287_p1), [#allocation6], 2048   ;;  %p3288_p4 = pmov %p3287_p1 }
  0x9d   : > { %s511_s15 = sand.u32 1, %s2581_s23   ;;  %s2799_s8 = sand.u32 1, %s2460_s18  }
  0x9e   : > { %2437 = vsyncadd (%p3288_p4), [#allocation6], 4294965248  ;;  %s1647_s30 = sshll.u32 %s2799_s8, 7  ;;  %s512_s10 = scalar_lea.sflag [#allocation3], %s511_s15 }
  0x9f   : > { %s2804_s25 = scalar_lea.vmem [#allocation7], %s1647_s30  ;;  %p3289_p2 = scmp.ne.s32.totalorder %s3265_s27, 0 }
  0xa1   : > { %2439 = dma.done.wait (%p3289_p2), %s512_s10, 4096  }
  0xa2   : > { %2441 = vsyncadd (%p3289_p2), %s512_s10, 4294963200  ;;  %v2810_v0 = vld [vmem:[#allocation5] sm:$0xff]  ;;  %s2812_s6 = scalar_lea.vmem [#allocation8], %s1647_s30  ;;  %v2819_v4 = vld [vmem:[#allocation5 + $0x8] sm:$0xff]  ;;  %p609_p11 = scmp.lt.s32.totalorder %s2468_s20, 2 }
  0xa3   : > { %v2815_v1 = vld [vmem:[%s2812_s6] sm:$0xff]  ;;  %v653_v2 = vand.u32 2147483647, %v2810_v0  ;;  %v2822_v5 = vld [vmem:[%s2812_s6 + $0x8] sm:$0xff]  ;;  %v654_v8 = vand.u32 2147483647, %v2819_v4 }
  0xa4   : > { %v813_v3 = vand.u32 2147483647, %v2815_v1  ;;  %v814_v9 = vand.u32 2147483647, %v2822_v5  ;;  %v2826_v10 = vld [vmem:[#allocation5 + $0x10] sm:$0xff]  ;;  %v2833_v19 = vld [vmem:[#allocation5 + $0x18] sm:$0xff] }
  0xa5   : > { %v669_v6 = vsub.f32 0.0, %v653_v2  ;;  %v2829_v11 = vld [vmem:[%s2812_s6 + $0x10] sm:$0xff]  ;;  %v670_v14 = vsub.f32 0.0, %v654_v8  ;;  %v655_v16 = vand.u32 2147483647, %v2826_v10  ;;  %v2836_v23 = vld [vmem:[%s2812_s6 + $0x18] sm:$0xff] }
  0xa6   : > { %v829_v7 = vsub.f32 0.0, %v813_v3  ;;  %v830_v15 = vsub.f32 0.0, %v814_v9  ;;  %v815_v17 = vand.u32 2147483647, %v2829_v11  ;;  %v656_v24 = vand.u32 2147483647, %v2833_v19 }
  0xa7   : > { %v685_v12 = vmul.f32 1.442695, %v669_v6  ;;  %v687_v18 = vmul.f32 1.442695, %v670_v14  ;;  %v671_v21 = vsub.f32 0.0, %v655_v16  ;;  %v2839_v25 = vld [vmem:[#allocation5 + $0x20] sm:$0xff] }
  0xa8   : > { %v845_v13 = vmul.f32 1.442695, %v829_v7  ;;  %v847_v20 = vmul.f32 1.442695, %v830_v15  ;;  %v831_v22 = vsub.f32 0.0, %v815_v17  ;;  %v672_v29 = vsub.f32 0.0, %v656_v24 }
  0xa9   : > { %2042 = vpow2.f32 %v685_v12  ;;  %v689_v26 = vmul.f32 1.442695, %v671_v21  ;;  %v816_v28 = vand.u32 2147483647, %v2836_v23  ;;  %v657_v30 = vand.u32 2147483647, %v2839_v25 }
  0xaa   : > { %2044 = vpow2.f32 %v845_v13  ;;  %v849_v27 = vmul.f32 1.442695, %v831_v22  ;;  %v2844_v31 = vld [vmem:[%s2812_s6 + $0x20] sm:$0xff]  ;;  %v2847_v34 = vld [vmem:[#allocation5 + $0x28] sm:$0xff]  ;;  %v637_v35 = vmax.f32 %v2810_v0, 0.0  ;;  %v797_v39 = vmax.f32 %v2815_v1, 0.0 }
  0xab   : > { %2046 = vpow2.f32 %v687_v18  ;;  %v832_v32 = vsub.f32 0.0, %v816_v28  ;;  %v817_v33 = vand.u32 2147483647, %v2844_v31  ;;  %v691_v36 = vmul.f32 1.442695, %v672_v29  ;;  %v2851_v38 = vld [vmem:[%s2812_s6 + $0x28] sm:$0xff] }
  0xac   : > { %2048 = vpow2.f32 %v847_v20  ;;  %v673_v37 = vsub.f32 0.0, %v657_v30  ;;  %v658_v42 = vand.u32 2147483647, %v2847_v34  ;;  %v638_v43 = vmax.f32 %v2819_v4, 0.0  ;;  %v2857_v46 = vld [vmem:[#allocation5 + $0x30] sm:$0xff]  ;;  %v2867_v59 = vld [vmem:[#allocation5 + $0x38] sm:$0xff] }
  0xad   : > { %2050 = vpow2.f32 %v689_v26  ;;  %v851_v40 = vmul.f32 1.442695, %v832_v32  ;;  %v833_v41 = vsub.f32 0.0, %v817_v33  ;;  %v818_v45 = vand.u32 2147483647, %v2851_v38  ;;  %v2861_v50 = vld [vmem:[%s2812_s6 + $0x30] sm:$0xff] }
  0xae   : > { %2052 = vpow2.f32 %v849_v27  ;;  %v693_v44 = vmul.f32 1.442695, %v673_v37  ;;  %v798_v47 = vmax.f32 %v2822_v5, 0.0  ;;  %v674_v49 = vsub.f32 0.0, %v658_v42  ;;  %v2873_v3 = vld [vmem:[%s2812_s6 + $0x38] sm:$0xff]  ;;  %v2876_v12 = vld [vmem:[#allocation5 + $0x40] sm:$0xff] }
  0xaf   : > { %2054 = vpow2.f32 %v691_v36  ;;  %v853_v48 = vmul.f32 1.442695, %v833_v41  ;;  %v639_v52 = vmax.f32 %v2826_v10, 0.0  ;;  %v799_v53 = vmax.f32 %v2829_v11, 0.0  ;;  %v2882_v21 = vld [vmem:[%s2812_s6 + $0x40] sm:$0xff]  ;;  %s3006_s27 = scalar_select %p609_p11, %s2468_s20, 2 }
  0xb0   : > { %2056 = vpow2.f32 %v851_v40  ;;  %v640_v54 = vmax.f32 %v2833_v19, 0.0  ;;  %v834_v57 = vsub.f32 0.0, %v818_v45  ;;  %v659_v58 = vand.u32 2147483647, %v2857_v46  ;;  %v2889_v40 = vld [vmem:[#allocation5 + $0x48] sm:$0xff]  ;;  %s3290_s0 = sld [smem:[#allocation31_spill]] }
  0xb1   : > { %2058 = vpow2.f32 %v693_v44  ;;  %v800_v62 = vmax.f32 %v2836_v23, 0.0  ;;  %v641_v63 = vmax.f32 %v2839_v25, 0.0  ;;  %v819_v2 = vand.u32 2147483647, %v2861_v50  ;;  %s3291_s19 = sld [smem:[#allocation30_spill]]  ;;  %s3292_s24 = sld [smem:[#allocation29_spill]] }
  0xb2   : > { %2060 = vpow2.f32 %v853_v48  ;;  %v801_v8 = vmax.f32 %v2844_v31, 0.0  ;;  %v695_v9 = vmul.f32 1.442695, %v674_v49  ;;  %v642_v14 = vmax.f32 %v2847_v34, 0.0  ;;  %v2892_v48 = vld [vmem:[%s2812_s6 + $0x48] sm:$0xff]  ;;  %v2934_v31 = vld [vmem:[#allocation5 + $0x58] sm:$0xff] }
  0xb3   : > { %v2043_v51 = vpop.eup %2042  ;;  %v660_v15 = vand.u32 2147483647, %v2867_v59  ;;  %v855_v17 = vmul.f32 1.442695, %v834_v57  ;;  %v675_v18 = vsub.f32 0.0, %v659_v58  ;;  %v835_v26 = vsub.f32 0.0, %v819_v2 }
  0xb4   : > { %v2045_v55 = vpop.eup %2044  ;;  %v717_v56 = vadd.f32 1.0, %v2043_v51  ;;  %v820_v20 = vand.u32 2147483647, %v2873_v3  ;;  %v661_v27 = vand.u32 2147483647, %v2876_v12  ;;  %v802_v29 = vmax.f32 %v2851_v38, 0.0 }
  0xb5   : > { %v2047_v60 = vpop.eup %2046  ;;  %v877_v61 = vadd.f32 1.0, %v2045_v55  ;;  %v643_v30 = vmax.f32 %v2857_v46, 0.0  ;;  %v803_v33 = vmax.f32 %v2861_v50, 0.0  ;;  %v676_v36 = vsub.f32 0.0, %v660_v15  ;;  %v2894_v57 = vld [vmem:[#allocation5 + $0x50] sm:$0xff]  ;;  %v2968_v50 = vld [vmem:[#allocation5 + $0x68] sm:$0xff] }
  0xb6   : > { %v2049_v6 = vpop.eup %2048  ;;  %2062 = vlog2.f32 %v717_v56  ;;  %v718_v7 = vadd.f32 1.0, %v2047_v60  ;;  %v821_v37 = vand.u32 2147483647, %v2882_v21  ;;  %v697_v44 = vmul.f32 1.442695, %v675_v18  ;;  %s620_s2 = scalar_lea.vmem %s3290_s0, %s3006_s27  ;;  %s3293_s17 = sld [smem:[#allocation23_spill]] }
  0xb7   : > { %2064 = vlog2.f32 %v877_v61  ;;  %v878_v13 = vadd.f32 1.0, %v2049_v6  ;;  %v2051_v16 = vpop.eup %2050  ;;  %v836_v45 = vsub.f32 0.0, %v820_v20  ;;  %v857_v55 = vmul.f32 1.442695, %v835_v26  ;;  %s614_s14 = scalar_lea.vmem %s3291_s19, %s3006_s27  ;;  %s592_s29 = scalar_lea.vmem [#allocation12], %s2799_s8 }
  0xb8   : > { %2066 = vlog2.f32 %v718_v7  ;;  %v2053_v22 = vpop.eup %2052  ;;  %v719_v24 = vadd.f32 1.0, %v2051_v16  ;;  %v677_v56 = vsub.f32 0.0, %v661_v27  ;;  %v837_v61 = vsub.f32 0.0, %v821_v37  ;;  %s1689_s28 = sshll.u32 %s2468_s20, 4  ;;  %s598_s30 = scalar_lea.vmem [#allocation13], %s2799_s8 }
  0xb9   : > { %2068 = vlog2.f32 %v878_v13  ;;  %v879_v28 = vadd.f32 1.0, %v2053_v22  ;;  %v2055_v32 = vpop.eup %2054  ;;  %v662_v2 = vand.u32 2147483647, %v2889_v40  ;;  %v699_v7 = vmul.f32 1.442695, %v676_v36  ;;  %v957_v22 = vld [vmem:[%s2804_s25] sm:$0xff] }
  0xba   : > { %2070 = vpow2.f32 %v695_v9  ;;  %v2057_v41 = vpop.eup %2056  ;;  %v720_v42 = vadd.f32 1.0, %v2055_v32  ;;  %v822_v9 = vand.u32 2147483647, %v2892_v48  ;;  %v859_v15 = vmul.f32 1.442695, %v836_v45  ;;  %s1364_s13 = sshll.u32 %s598_s30, 4  ;;  %s1365_s13 = int_to_ptr.vmem [resolvable:$true] %s1364_s13 }
  0xbb   : > { %2072 = vlog2.f32 %v719_v24  ;;  %v2059_v49 = vpop.eup %2058  ;;  %v880_v51 = vadd.f32 1.0, %v2057_v41  ;;  %v678_v16 = vsub.f32 0.0, %v662_v2  ;;  %v701_v24 = vmul.f32 1.442695, %v677_v56  ;;  %v941_v56 = vld [vmem:[#allocation2] sm:$0xff]  ;;  %s1303_s4 = scalar_lea.sflag [#allocation14], %s2799_s8 }
  0xbc   : > { %2074 = vlog2.f32 %v879_v28  ;;  %v2061_v58 = vpop.eup %2060  ;;  %v721_v60 = vadd.f32 1.0, %v2059_v49  ;;  %v838_v26 = vsub.f32 0.0, %v822_v9  ;;  %v861_v32 = vmul.f32 1.442695, %v837_v61  ;;  %s2294_s12 = scalar_lea.vmem %s1365_s13, 16  ;;  %p3295_p10 = scmp.ne.s32.totalorder %s3293_s17, 0 }
  0xbd   : > { %2076 = vpow2.f32 %v855_v17  ;;  %v881_v6 = vadd.f32 1.0, %v2061_v58  ;;  %v663_v17 = vand.u32 2147483647, %v2894_v57  ;;  %v2900_v36 = vmul.f32 1.442695, %v678_v16  ;;  %p2295_p13 = scmp.ne.s32.totalorder %s1365_s13, %s2294_s12  ;;  %s2484_s9 = smov [#allocation13]  }
  0xbe   : > { %2078 = vlog2.f32 %v720_v42  ;;  %v645_v34 = vmax.f32 %v2876_v12, 0.0  ;;  %s2298_s0 = sshll.u32 %s2484_s9, 4  ;;  %s2299_s0 = int_to_ptr.vmem [resolvable:$false] %s2298_s0 }
  0xbf   : > { %2080 = vlog2.f32 %v880_v51  ;;  %v2904_v45 = vsub.f32 0.0, %v663_v17  ;;  %p2296_p8 = pnand %p2295_p13, %p3295_p10  ;;  %p2301_p0 = scmp.lt.s32.totalorder %s1365_s13, %s2299_s0 }
  0xc0   : > { %v2063_v13 = vpop.eup %2062  ;;  %2082 = vlog2.f32 %v721_v60  ;;  %v958_v60 = vld [vmem:[%s2804_s25 + $0x8] sm:$0xff] }
  0xc1   : > { %v2065_v18 = vpop.eup %2064  ;;  %v734_v20 = vmul.f32 0.6931472, %v2063_v13  ;;  %2084 = vlog2.f32 %v881_v6  ;;  %p2297_p12 = pneg %p2296_p8 }
  0xc2   : > { %v2067_v27 = vpop.eup %2066  ;;  %v894_v28 = vmul.f32 0.6931472, %v2065_v18  ;;  %2086 = vpow2.f32 %v697_v44  ;;  %v2909_v44 = vmul.f32 1.442695, %v838_v26  ;;  %v959_v18 = vld [vmem:[%s2804_s25 + $0x10] sm:$0xff] }
  0xc3   : > { %v2069_v37 = vpop.eup %2068  ;;  %v765_v41 = vadd.f32 %v734_v20, %v637_v35  ;;  %v736_v42 = vmul.f32 0.6931472, %v2067_v27  ;;  %2088 = vpow2.f32 %v857_v55 }
  0xc4   : > { %v2071_v49 = vpop.eup %2070  ;;  %v925_v51 = vadd.f32 %v894_v28, %v797_v39  ;;  %v896_v58 = vmul.f32 0.6931472, %v2069_v37  ;;  %2090 = vpow2.f32 %v699_v7  ;;  %v942_v39 = vld [vmem:[#allocation2 + $0x8] sm:$0xff] }
  0xc5   : > { %v2073_v61 = vpop.eup %2072  ;;  %v973_v2 = vmul.f32 %v957_v22, %v765_v41  ;;  %v766_v0 = vadd.f32 %v736_v42, %v638_v43  ;;  %v722_v35 = vadd.f32 1.0, %v2071_v49  ;;  %2092 = vpow2.f32 %v859_v15 }
  0xc6   : > { %v2075_v55 = vpop.eup %2074  ;;  %v1005_v6 = vmul.f32 %v925_v51, %v765_v41  ;;  %v926_v1 = vadd.f32 %v896_v58, %v798_v47  ;;  %v738_v9 = vmul.f32 0.6931472, %v2073_v61  ;;  %2094 = vpow2.f32 %v701_v24  ;;  %v943_v24 = vld [vmem:[#allocation2 + $0x10] sm:$0xff]  ;;  %v960_v51 = vld [vmem:[%s2804_s25 + $0x18] sm:$0xff] }
  0xc7   : > { %v2077_v13 = vpop.eup %2076  ;;  %v989_v7 = vadd.f32 %v973_v2, %v941_v56  ;;  %v974_v16 = vmul.f32 %v958_v60, %v766_v0  ;;  %v898_v17 = vmul.f32 0.6931472, %v2075_v55  ;;  %2096 = vlog2.f32 %v722_v35  ;;  %v944_v61 = vld [vmem:[#allocation2 + $0x18] sm:$0xff] }
  0xc8   : > { %v2079_v20 = vpop.eup %2078  ;;  %v1133_v4 = vmul.f32 %v1005_v6, %v1005_v6  ;;  %v1006_v43 = vmul.f32 %v926_v1, %v766_v0  ;;  %v767_v15 = vadd.f32 %v738_v9, %v639_v52  ;;  %v882_v22 = vadd.f32 1.0, %v2077_v13  ;;  %v961_v0 = vld [vmem:[%s2804_s25 + $0x20] sm:$0xff] }
  0xc9   : > { %v2081_v26 = vpop.eup %2080  ;;  %v990_v5 = vadd.f32 %v974_v16, %v942_v39  ;;  %v927_v47 = vadd.f32 %v898_v17, %v799_v53  ;;  %v740_v27 = vmul.f32 0.6931472, %v2079_v20  ;;  %2098 = vpow2.f32 %v861_v32  ;;  %v945_v16 = vld [vmem:[#allocation2 + $0x20] sm:$0xff] }
  0xca   : > { %v2083_v28 = vpop.eup %2082  ;;  %v1930_v37 = vpack.i.bf16 %v989_v7, %v1133_v4  ;;  %v1134_v41 = vmul.f32 %v1006_v43, %v1006_v43  ;;  %v975_v42 = vmul.f32 %v959_v18, %v767_v15  ;;  %v900_v49 = vmul.f32 0.6931472, %v2081_v26  ;;  %v2932_v4 = vld [vmem:[%s2812_s6 + $0x50] sm:$0xff] }
  0xcb   : > { %v2085_v56 = vpop.eup %2084  ;;  %v1007_v58 = vmul.f32 %v927_v47, %v767_v15  ;;  %v768_v10 = vadd.f32 %v740_v27, %v640_v54  ;;  %v742_v52 = vmul.f32 0.6931472, %v2083_v28  ;;  %2100 = vlog2.f32 %v882_v22  ;;  %v962_v27 = vld [vmem:[%s2804_s25 + $0x28] sm:$0xff] }
  0xcc   : > { %v2087_v60 = vpop.eup %2086  ;;  %1931 = vxpose.xlu0.b32.start [1/16] %v1930_v37, 128  ;;  %v1932_v11 = vpack.i.bf16 %v990_v5, %v1134_v41  ;;  %v991_v53 = vadd.f32 %v975_v42, %v943_v24  ;;  %v928_v32 = vadd.f32 %v900_v49, %v800_v62  ;;  %v902_v2 = vmul.f32 0.6931472, %v2085_v56  ;;  %v2943_v41 = vld [vmem:[%s2812_s6 + $0x58] sm:$0xff] }
  0xcd   : > { %v2089_v35 = vpop.eup %2088  ;;  %v1135_v55 = vmul.f32 %v1007_v58, %v1007_v58  ;;  %v976_v6 = vmul.f32 %v960_v51, %v768_v10  ;;  %v769_v1 = vadd.f32 %v742_v52, %v641_v63  ;;  %v723_v19 = vadd.f32 1.0, %v2087_v60  ;;  %v946_v60 = vld [vmem:[#allocation2 + $0x28] sm:$0xff] }
  0xce   : > { %v2091_v54 = vpop.eup %2090  ;;  %v1008_v39 = vmul.f32 %v928_v32, %v768_v10  ;;  %v929_v9 = vadd.f32 %v902_v2, %v801_v8  ;;  %v883_v13 = vadd.f32 1.0, %v2089_v35  ;;  %2102 = vpow2.f32 %v2900_v36  ;;  %v2948_v10 = vld [vmem:[#allocation5 + $0x60] sm:$0xff] }
  0xcf   : > { %v2093_v23 = vpop.eup %2092  ;;  %v1934_v62 = vpack.i.bf16 %v991_v53, %v1135_v55  ;;  %v992_v7 = vadd.f32 %v976_v6, %v944_v61  ;;  %v977_v17 = vmul.f32 %v961_v0, %v769_v1  ;;  %2104 = vlog2.f32 %v723_v19  ;;  %v2952_v32 = vld [vmem:[%s2812_s6 + $0x60] sm:$0xff] }
  0xd0   : > { %v2095_v18 = vpop.eup %2094  ;;  %1933 = vxpose.xlu0.b32.cont [2/16] %v1932_v11, 128  ;;  %v1136_v25 = vmul.f32 %v1008_v39, %v1008_v39  ;;  %v1009_v63 = vmul.f32 %v929_v9, %v769_v1  ;;  %2106 = vlog2.f32 %v883_v13  ;;  %v724_v20 = vadd.f32 1.0, %v2091_v54 }
  0xd1   : > { %v2097_v8 = vpop.eup %2096  ;;  %v884_v36 = vadd.f32 1.0, %v2093_v23  ;;  %v725_v43 = vadd.f32 1.0, %v2095_v18  ;;  %2108 = vpow2.f32 %v2909_v44  ;;  %v705_v15 = vmul.f32 1.442695, %v2904_v45 }
  0xd2   : > { %v993_v22 = vadd.f32 %v977_v17, %v945_v16  ;;  %v744_v26 = vmul.f32 0.6931472, %v2097_v8  ;;  %v644_v5 = vmax.f32 %v2867_v59, 0.0  ;;  %2110 = vlog2.f32 %v724_v20  ;;  %v963_v17 = vld [vmem:[%s2804_s25 + $0x30] sm:$0xff] }
  0xd3   : > { %v2099_v47 = vpop.eup %2098  ;;  %v1936_v24 = vpack.i.bf16 %v992_v7, %v1136_v25  ;;  %2112 = vlog2.f32 %v884_v36  ;;  %v823_v28 = vand.u32 2147483647, %v2932_v4  ;;  %v664_v37 = vand.u32 2147483647, %v2934_v31  ;;  %v947_v20 = vld [vmem:[#allocation2 + $0x30] sm:$0xff] }
  0xd4   : > { %1935 = vxpose.xlu0.b32.cont [3/16] %v1934_v62, 128  ;;  %v1137_v44 = vmul.f32 %v1009_v63, %v1009_v63  ;;  %v770_v45 = vadd.f32 %v744_v26, %v642_v14  ;;  %2114 = vlog2.f32 %v725_v43  ;;  %v885_v42 = vadd.f32 1.0, %v2099_v47 }
  0xd5   : > { %v2101_v49 = vpop.eup %2100  ;;  %v804_v51 = vmax.f32 %v2873_v3, 0.0  ;;  %2116 = vpow2.f32 %v705_v15  ;;  %v839_v56 = vsub.f32 0.0, %v823_v28  ;;  %v680_v58 = vsub.f32 0.0, %v664_v37  ;;  %v964_v37 = vld [vmem:[%s2804_s25 + $0x38] sm:$0xff] }
  0xd6   : > { %v904_v52 = vmul.f32 0.6931472, %v2101_v49  ;;  %v978_v11 = vmul.f32 %v962_v27, %v770_v45  ;;  %2118 = vlog2.f32 %v885_v42  ;;  %v824_v53 = vand.u32 2147483647, %v2943_v41 }
  0xd7   : > { %v805_v14 = vmax.f32 %v2882_v21, 0.0  ;;  %v865_v61 = vmul.f32 1.442695, %v839_v56  ;;  %v707_v2 = vmul.f32 1.442695, %v680_v58  ;;  %v1938_v35 = vpack.i.bf16 %v993_v22, %v1137_v44  ;;  %v948_v56 = vld [vmem:[#allocation2 + $0x38] sm:$0xff] }
  0xd8   : > { %v2103_v0 = vpop.eup %2102  ;;  %1937 = vxpose.xlu0.b32.cont [4/16] %v1936_v24, 128  ;;  %v930_v55 = vadd.f32 %v904_v52, %v802_v29  ;;  %v840_v6 = vsub.f32 0.0, %v824_v53  ;;  %v665_v1 = vand.u32 2147483647, %v2948_v10  ;;  %v994_v54 = vadd.f32 %v978_v11, %v946_v60  ;;  %v965_v58 = vld [vmem:[%s2804_s25 + $0x40] sm:$0xff] }
  0xd9   : > { %v2105_v19 = vpop.eup %2104  ;;  %v726_v39 = vadd.f32 1.0, %v2103_v0  ;;  %2120 = vpow2.f32 %v865_v61  ;;  %v825_v12 = vand.u32 2147483647, %v2952_v32  ;;  %v646_v0 = vmax.f32 %v2889_v40, 0.0 }
  0xda   : > { %v2107_v9 = vpop.eup %2106  ;;  %v1010_v13 = vmul.f32 %v930_v55, %v770_v45  ;;  %v746_v23 = vmul.f32 0.6931472, %v2105_v19  ;;  %2122 = vpow2.f32 %v707_v2  ;;  %v867_v62 = vmul.f32 1.442695, %v840_v6  ;;  %v949_v2 = vld [vmem:[#allocation2 + $0x40] sm:$0xff] }
  0xdb   : > { %v2109_v7 = vpop.eup %2108  ;;  %v906_v16 = vmul.f32 0.6931472, %v2107_v9  ;;  %2124 = vlog2.f32 %v726_v39  ;;  %v681_v38 = vsub.f32 0.0, %v665_v1  ;;  %v841_v29 = vsub.f32 0.0, %v825_v12 }
  0xdc   : > { %v2111_v18 = vpop.eup %2110  ;;  %1939 = vxpose.xlu0.b32.cont [5/16] %v1938_v35, 128  ;;  %v1138_v25 = vmul.f32 %v1010_v13, %v1010_v13  ;;  %v771_v63 = vadd.f32 %v746_v23, %v643_v30  ;;  %v886_v8 = vadd.f32 1.0, %v2109_v7  ;;  %2126 = vpow2.f32 %v867_v62  ;;  %v2982_v7 = vld [vmem:[#allocation5 + $0x70] sm:$0xff] }
  0xdd   : > { %v2113_v36 = vpop.eup %2112  ;;  %v931_v43 = vadd.f32 %v906_v16, %v803_v33  ;;  %v748_v15 = vmul.f32 0.6931472, %v2111_v18  ;;  %v709_v22 = vmul.f32 1.442695, %v681_v38  ;;  %v869_v26 = vmul.f32 1.442695, %v841_v29 }
  0xde   : > { %v2115_v47 = vpop.eup %2114  ;;  %v1940_v24 = vpack.i.bf16 %v994_v54, %v1138_v25  ;;  %v979_v27 = vmul.f32 %v963_v17, %v771_v63  ;;  %v908_v28 = vmul.f32 0.6931472, %v2113_v36  ;;  %2128 = vlog2.f32 %v886_v8  ;;  %v966_v29 = vld [vmem:[%s2804_s25 + $0x48] sm:$0xff] }
  0xdf   : > { %v2117_v44 = vpop.eup %2116  ;;  %v1011_v46 = vmul.f32 %v931_v43, %v771_v63  ;;  %v772_v30 = vadd.f32 %v748_v15, %v644_v5  ;;  %v750_v45 = vmul.f32 0.6931472, %v2115_v47  ;;  %2130 = vpow2.f32 %v709_v22  ;;  %v2974_v5 = vld [vmem:[%s2812_s6 + $0x68] sm:$0xff]  ;;  %v2986_v63 = vld [vmem:[%s2812_s6 + $0x70] sm:$0xff] }
  0xe0   : > { %v2119_v33 = vpop.eup %2118  ;;  %1941 = vxpose.xlu0.b32.cont [6/16] %v1940_v24, 128  ;;  %v995_v42 = vadd.f32 %v979_v27, %v947_v20  ;;  %v932_v49 = vadd.f32 %v908_v28, %v804_v51  ;;  %v727_v52 = vadd.f32 1.0, %v2117_v44  ;;  %2132 = vpow2.f32 %v869_v26  ;;  %v950_v22 = vld [vmem:[#allocation2 + $0x48] sm:$0xff]  ;;  %v2990_v44 = vld [vmem:[#allocation5 + $0x78] sm:$0xff] }
  0xe1   : > { %v1139_v60 = vmul.f32 %v1011_v46, %v1011_v46  ;;  %v980_v11 = vmul.f32 %v964_v37, %v772_v30  ;;  %v773_v53 = vadd.f32 %v750_v45, %v645_v34  ;;  %v910_v59 = vmul.f32 0.6931472, %v2119_v33  ;;  %v2994_v33 = vld [vmem:[%s2812_s6 + $0x78] sm:$0xff]  ;;  %s3294_s6 = sld [smem:[#allocation35_spill]] }
  0xe2   : > { %v1012_v61 = vmul.f32 %v932_v49, %v772_v30  ;;  %2134 = vlog2.f32 %v727_v52  ;;  %v666_v35 = vand.u32 2147483647, %v2968_v50  ;;  %v826_v12 = vand.u32 2147483647, %v2974_v5 }
  0xe3   : > { %v2121_v55 = vpop.eup %2120  ;;  %v1942_v3 = vpack.i.bf16 %v995_v42, %v1139_v60  ;;  %v996_v51 = vadd.f32 %v980_v11, %v948_v56  ;;  %v933_v6 = vadd.f32 %v910_v59, %v805_v14  ;;  %v981_v1 = vmul.f32 %v965_v58, %v773_v53 }
  0xe4   : > { %v2123_v19 = vpop.eup %2122  ;;  %v1140_v54 = vmul.f32 %v1012_v61, %v1012_v61  ;;  %v887_v34 = vadd.f32 1.0, %v2121_v55  ;;  %v682_v39 = vsub.f32 0.0, %v666_v35  ;;  %v806_v23 = vmax.f32 %v2892_v48, 0.0 }
  0xe5   : > { %v2125_v9 = vpop.eup %2124  ;;  %1943 = vxpose.xlu0.b32.cont [7/16] %v1942_v3, 128  ;;  %v997_v40 = vadd.f32 %v981_v1, %v949_v2  ;;  %v1013_v13 = vmul.f32 %v933_v6, %v773_v53  ;;  %v728_v62 = vadd.f32 1.0, %v2123_v19  ;;  %v842_v25 = vsub.f32 0.0, %v826_v12  ;;  %v967_v53 = vld [vmem:[%s2804_s25 + $0x50] sm:$0xff] }
  0xe6   : > { %v2127_v21 = vpop.eup %2126  ;;  %v1944_v14 = vpack.i.bf16 %v996_v51, %v1140_v54  ;;  %v752_v16 = vmul.f32 0.6931472, %v2125_v9  ;;  %2136 = vlog2.f32 %v887_v34  ;;  %v711_v17 = vmul.f32 1.442695, %v682_v39  ;;  %v951_v54 = vld [vmem:[#allocation2 + $0x50] sm:$0xff] }
  0xe7   : > { %v1141_v38 = vmul.f32 %v1013_v13, %v1013_v13  ;;  %2138 = vlog2.f32 %v728_v62  ;;  %v888_v18 = vadd.f32 1.0, %v2127_v21  ;;  %v667_v48 = vand.u32 2147483647, %v2982_v7  ;;  %s3051_s27 = scalar_lea.hbm %s3294_s6, %s1689_s28 }
  0xe8   : > { %v2129_v20 = vpop.eup %2128  ;;  %v774_v8 = vadd.f32 %v752_v16, %v646_v0  ;;  %2140 = vpow2.f32 %v711_v17  ;;  %v871_v26 = vmul.f32 1.442695, %v842_v25  ;;  %v827_v37 = vand.u32 2147483647, %v2986_v63  ;;  %v3012_v25 = vld [vmem:[%s3227_s5] sm:$0x1] }
  0xe9   : > { %v2131_v36 = vpop.eup %2130  ;;  %1945 = vxpose.xlu0.b32.cont [8/16] %v1944_v14, 128  ;;  %v1946_v43 = vpack.i.bf16 %v997_v40, %v1141_v38  ;;  %v912_v15 = vmul.f32 0.6931472, %v2129_v20  ;;  %2142 = vlog2.f32 %v888_v18  ;;  %v683_v28 = vsub.f32 0.0, %v667_v48 }
  0xea   : > { %v2133_v47 = vpop.eup %2132  ;;  %v982_v24 = vmul.f32 %v966_v29, %v774_v8  ;;  %v729_v27 = vadd.f32 1.0, %v2131_v36  ;;  %v647_v30 = vmax.f32 %v2894_v57, 0.0  ;;  %2144 = vpow2.f32 %v871_v26 }
  0xeb   : > { %v934_v46 = vadd.f32 %v912_v15, %v806_v23  ;;  %v889_v45 = vadd.f32 1.0, %v2133_v47  ;;  %v713_v56 = vmul.f32 1.442695, %v683_v28  ;;  %v843_v58 = vsub.f32 0.0, %v827_v37  ;;  %v3020_v28 = vld [vmem:[%s620_s2] sm:$0x1] }
  0xec   : > { %v2135_v42 = vpop.eup %2134  ;;  %v998_v49 = vadd.f32 %v982_v24, %v950_v22  ;;  %2146 = vlog2.f32 %v729_v27  ;;  %v668_v11 = vand.u32 2147483647, %v2990_v44  ;;  %v828_v57 = vand.u32 2147483647, %v2994_v33  ;;  %v969_v27 = vld [vmem:[%s2804_s25 + $0x60] sm:$0xff]  ;;  %s2300_s2 = scalar_lea.vmem %s2299_s0, 32 }
  0xed   : > { %1947 = vxpose.xlu0.b32.cont [9/16] %v1946_v43, 128  ;;  %v1014_v52 = vmul.f32 %v934_v46, %v774_v8  ;;  %v754_v60 = vmul.f32 0.6931472, %v2135_v42  ;;  %2148 = vlog2.f32 %v889_v45  ;;  %v873_v59 = vmul.f32 1.442695, %v843_v58  ;;  %v953_v58 = vld [vmem:[#allocation2 + $0x60] sm:$0xff]  ;;  %p2302_p5 = scmp.lt.s32.totalorder %s2300_s2, %s2294_s12 }
  0xee   : > { %2150 = vpow2.f32 %v713_v56  ;;  %v807_v0 = vmax.f32 %v2932_v4, 0.0  ;;  %v684_v35 = vsub.f32 0.0, %v668_v11  ;;  %v648_v3 = vmax.f32 %v2934_v31, 0.0  ;;  %v968_v31 = vld [vmem:[%s2804_s25 + $0x58] sm:$0xff] }
  0xef   : > { %v1142_v61 = vmul.f32 %v1014_v52, %v1014_v52  ;;  %v775_v2 = vadd.f32 %v754_v60, %v647_v30  ;;  %2152 = vpow2.f32 %v873_v59  ;;  %v844_v51 = vsub.f32 0.0, %v828_v57  ;;  %p2303_p3 = por %p2302_p5, %p2301_p0 }
  0xf0   : > { %v2137_v55 = vpop.eup %2136  ;;  %v715_v39 = vmul.f32 1.442695, %v684_v35  ;;  %v808_v40 = vmax.f32 %v2943_v41, 0.0  ;;  %v649_v16 = vmax.f32 %v2948_v10, 0.0  ;;  %v952_v41 = vld [vmem:[#allocation2 + $0x58] sm:$0xff]  ;;  %v809_v18 = vmax.f32 %v2952_v32, 0.0 }
  0xf1   : > { %v2139_v6 = vpop.eup %2138  ;;  %v1948_v1 = vpack.i.bf16 %v998_v49, %v1142_v61  ;;  %v914_v19 = vmul.f32 0.6931472, %v2137_v55  ;;  %v983_v34 = vmul.f32 %v967_v53, %v775_v2  ;;  %v875_v4 = vmul.f32 1.442695, %v844_v51  ;;  %p2304_p6 = pnand %p2303_p3, %p2297_p12 }
  0xf2   : > { %v2141_v12 = vpop.eup %2140  ;;  %v756_v9 = vmul.f32 0.6931472, %v2139_v6  ;;  %2154 = vpow2.f32 %v715_v39  ;;  %v1263_v36 = vand.u32 2147483647, %v3012_v25  ;;  %v1273_v52 = vand.u32 2147483647, %v3020_v28 }
  0xf3   : > { %v2143_v13 = vpop.eup %2142  ;;  %1949 = vxpose.xlu0.b32.cont [10/16] %v1948_v1, 128  ;;  %v935_v23 = vadd.f32 %v914_v19, %v807_v0  ;;  %v730_v62 = vadd.f32 1.0, %v2141_v12  ;;  %2156 = vpow2.f32 %v875_v4  ;;  %v999_v38 = vadd.f32 %v983_v34, %v951_v54  ;;  %v970_v12 = vld [vmem:[%s2804_s25 + $0x68] sm:$0xff] }
  0xf4   : > { %v776_v21 = vadd.f32 %v756_v9, %v648_v3  ;;  %v916_v14 = vmul.f32 0.6931472, %v2143_v13  ;;  %v2145_v17 = vpop.eup %2144  ;;  %v1264_v45 = vsub.f32 0.0, %v1263_v36  ;;  %v1274_v61 = vsub.f32 0.0, %v1273_v52  ;;  %v954_v4 = vld [vmem:[#allocation2 + $0x68] sm:$0xff] }
  0xf5   : > { %v1015_v29 = vmul.f32 %v935_v23, %v775_v2  ;;  %2158 = vlog2.f32 %v730_v62  ;;  %v890_v48 = vadd.f32 1.0, %v2145_v17  ;;  %v650_v35 = vmax.f32 %v2968_v50, 0.0 }
  0xf6   : > { %v2147_v20 = vpop.eup %2146  ;;  %v936_v8 = vadd.f32 %v916_v14, %v808_v40  ;;  %v984_v10 = vmul.f32 %v968_v31, %v776_v21  ;;  %v1265_v53 = vmul.f32 1.442695, %v1264_v45  ;;  %v1275_v6 = vmul.f32 1.442695, %v1274_v61 }
  0xf7   : > { %v2149_v43 = vpop.eup %2148  ;;  %v1143_v15 = vmul.f32 %v1015_v29, %v1015_v29  ;;  %v758_v22 = vmul.f32 0.6931472, %v2147_v20  ;;  %2160 = vlog2.f32 %v890_v48  ;;  %v810_v39 = vmax.f32 %v2974_v5, 0.0 }
  0xf8   : > { %v2151_v32 = vpop.eup %2150  ;;  %v1000_v26 = vadd.f32 %v984_v10, %v952_v41  ;;  %v1016_v47 = vmul.f32 %v936_v8, %v776_v21  ;;  %v918_v24 = vmul.f32 0.6931472, %v2149_v43  ;;  %v651_v23 = vmax.f32 %v2982_v7, 0.0  ;;  %v955_v8 = vld [vmem:[#allocation2 + $0x70] sm:$0xff] }
  0xf9   : > { %v1950_v37 = vpack.i.bf16 %v999_v38, %v1143_v15  ;;  %v777_v46 = vadd.f32 %v758_v22, %v649_v16  ;;  %v731_v30 = vadd.f32 1.0, %v2151_v32  ;;  %v2153_v42 = vpop.eup %2152  ;;  %v811_v14 = vmax.f32 %v2986_v63, 0.0  ;;  %v971_v38 = vld [vmem:[%s2804_s25 + $0x70] sm:$0xff] }
  0xfa   : > { %v1144_v49 = vmul.f32 %v1016_v47, %v1016_v47  ;;  %v937_v56 = vadd.f32 %v918_v24, %v809_v18  ;;  %v891_v11 = vadd.f32 1.0, %v2153_v42  ;;  %v652_v10 = vmax.f32 %v2990_v44, 0.0  ;;  %v956_v42 = vld [vmem:[#allocation2 + $0x78] sm:$0xff] }
  0xfb   : > { %1951 = vxpose.xlu0.b32.cont [11/16] %v1950_v37, 128  ;;  %v985_v60 = vmul.f32 %v969_v27, %v777_v46  ;;  %2162 = vlog2.f32 %v731_v30  ;;  %v812_v15 = vmax.f32 %v2994_v33, 0.0  ;;  %v972_v37 = vld [vmem:[%s2804_s25 + $0x78] sm:$0xff] }
  0xfc   : > { %v1952_v59 = vpack.i.bf16 %v1000_v26, %v1144_v49  ;;  %v1017_v57 = vmul.f32 %v937_v56, %v777_v46  ;;  %v2155_v2 = vpop.eup %2154  ;;  %2164 = vlog2.f32 %v891_v11  ;;  %v1262_v11 = vmax.f32 %v3012_v25, 0.0  ;;  %v1281_v25 = vld [vmem:[%s3292_s24] sm:$0x1] }
  0xfd   : > { %v1001_v0 = vadd.f32 %v985_v60, %v953_v58  ;;  %v2157_v55 = vpop.eup %2156  ;;  %v732_v51 = vadd.f32 1.0, %v2155_v2  ;;  %2166 = vpow2.f32 %v1265_v53  ;;  %v1272_v2 = vmax.f32 %v3020_v28, 0.0 }
  0xfe   : > { %v1145_v3 = vmul.f32 %v1017_v57, %v1017_v57  ;;  %v892_v19 = vadd.f32 1.0, %v2157_v55  ;;  %v1282_v57 = vld [vmem:[%s614_s14] sm:$0x1] }
  0xff   : > { %v2159_v1 = vpop.eup %2158  ;;  %1953 = vxpose.xlu0.b32.cont [12/16] %v1952_v59, 128  ;;  %2168 = vlog2.f32 %v732_v51 }
 0x100   : > { %v1954_v54 = vpack.i.bf16 %v1001_v0, %v1145_v3  ;;  %v760_v34 = vmul.f32 0.6931472, %v2159_v1  ;;  %2170 = vlog2.f32 %v892_v19 }
 0x101   : > { %v2161_v9 = vpop.eup %2160  ;;  %2172 = vpow2.f32 %v1275_v6 }
 0x102   : > { %v778_v40 = vadd.f32 %v760_v34, %v650_v35  ;;  %v920_v50 = vmul.f32 0.6931472, %v2161_v9 }
 0x103   : > { %1955 = vxpose.xlu0.b32.cont [13/16] %v1954_v54, 128 }
 0x104   : > { %v986_v13 = vmul.f32 %v970_v12, %v778_v40  ;;  %v938_v62 = vadd.f32 %v920_v50, %v810_v39 }
 0x105   : > { %v2163_v31 = vpop.eup %2162 }
 0x106   : > { %v762_v21 = vmul.f32 0.6931472, %v2163_v31  ;;  %v2165_v16 = vpop.eup %2164  ;;  %v1002_v17 = vadd.f32 %v986_v13, %v954_v4  ;;  %v1018_v5 = vmul.f32 %v938_v62, %v778_v40 }
 0x107   : > { %v2167_v29 = vpop.eup %2166  ;;  %v922_v18 = vmul.f32 0.6931472, %v2165_v16 }
 0x108   : > { %v779_v41 = vadd.f32 %v762_v21, %v651_v23  ;;  %v1146_v20 = vmul.f32 %v1018_v5, %v1018_v5  ;;  %v1267_v48 = vadd.f32 1.0, %v2167_v29 }
 0x109   : > { %v2169_v36 = vpop.eup %2168  ;;  %v939_v7 = vadd.f32 %v922_v18, %v811_v14 }
 0x10a   : > { %v987_v43 = vmul.f32 %v971_v38, %v779_v41  ;;  %v2171_v22 = vpop.eup %2170  ;;  %v1956_v63 = vpack.i.bf16 %v1002_v17, %v1146_v20  ;;  %v764_v32 = vmul.f32 0.6931472, %v2169_v36  ;;  %2174 = vlog2.f32 %v1267_v48 }
 0x10b   : > { %v2173_v26 = vpop.eup %2172  ;;  %v1019_v24 = vmul.f32 %v939_v7, %v779_v41  ;;  %v924_v27 = vmul.f32 0.6931472, %v2171_v22 }
 0x10c   : > { %v1003_v47 = vadd.f32 %v987_v43, %v955_v8  ;;  %1957 = vxpose.xlu0.b32.cont [14/16] %v1956_v63, 128  ;;  %v780_v46 = vadd.f32 %v764_v32, %v652_v10  ;;  %v1277_v30 = vadd.f32 1.0, %v2173_v26 }
 0x10d   : > { %v1147_v44 = vmul.f32 %v1019_v24, %v1019_v24  ;;  %v940_v45 = vadd.f32 %v924_v27, %v812_v15 }
 0x10e   : > { %v988_v49 = vmul.f32 %v972_v37, %v780_v46  ;;  %2176 = vlog2.f32 %v1277_v30 }
 0x10f   : > { %v1958_v56 = vpack.i.bf16 %v1003_v47, %v1147_v44  ;;  %v1020_v33 = vmul.f32 %v940_v45, %v780_v46 }
 0x110   : > { %v1004_v58 = vadd.f32 %v988_v49, %v956_v42 }
 0x111   : > { %1959 = vxpose.xlu0.b32.cont [15/16] %v1958_v56, 128  ;;  %v1148_v52 = vmul.f32 %v1020_v33, %v1020_v33 }
 0x113   : > { %v1960_v60 = vpack.i.bf16 %v1004_v58, %v1148_v52 }
 0x114   : > { %v2175_v53 = vpop.eup %2174 }
 0x115   : > { %1961 = vxpose.xlu0.b32.end [16/16] %v1960_v60, 128  ;;  %v1269_v59 = vmul.f32 0.6931472, %v2175_v53 }
 0x117   : > { %v1270_v61 = vadd.f32 %v1269_v59, %v1262_v11 }
 0x118   : > { %v2177_v0 = vpop.eup %2176 }
 0x119   : > { %v1283_v35 = vmul.f32 %v1282_v57, %v1270_v61  ;;  %v1279_v55 = vmul.f32 0.6931472, %v2177_v0 }
 0x11b   : > { %v1284_v3 = vadd.f32 %v1283_v35, %v1281_v25  ;;  %v1280_v51 = vadd.f32 %v1279_v55, %v1272_v2 }
 0x11d   : > { %v1286_v6 = vmul.f32 %v1280_v51, %v1270_v61  ;;  %1285 = vst [vmem:[%s592_s29] sm:$0x1] %v1284_v3 }
 0x11f   : > { %1287 = vst [vmem:[%s598_s30] sm:$0x1] %v1286_v6 }
 0x120   : > { %2307 = shalt.err (!%p2304_p6)
}
 0x121   : > { %s2308_s7 = scalar_lea.hbm %s3051_s27, 16  ;;  %s2312_s14 = scalar_lea.hbm %s3294_s6, 48 }
 0x122   : > { %p2309_p7 = scmp.ne.s32.totalorder %s3051_s27, %s2308_s7  ;;  %p2313_p4 = scmp.lt.u32.totalorder %s3051_s27, %s3294_s6 }
 0x123   : > { %p2314_p2 = scmp.lt.u32.totalorder %s2312_s14, %s2308_s7  ;;  %p2316_p13 = scmp.lt.u32.totalorder %s2308_s7, %s3051_s27 }
 0x124   : > { %p2310_p9 = pnand %p2309_p7, %p3295_p10 }
 0x125   : > { %p2315_p11 = por %p2314_p2, %p2313_p4 }
 0x126   : > { %p2311_p1 = pneg %p2310_p9 }
 0x127   : > { %p2317_p8 = por %p2316_p13, %p2315_p11 }
 0x129   : > { %p2318_p12 = pnand %p2317_p8, %p2311_p1 }
 0x12b   : > { %2321 = shalt.err (!%p2318_p12)
}
 0x12c   : > { %1838 = dma.vmem_to_hbm [thread:$0]  (%p3295_p10), %s1365_s13, 16, %s3051_s27, %s1303_s4  }
 0x12d   : > { %s1649_s24 = sshll.u32 %s2799_s8, 6  ;;  %s1727_s25 = sshll.u32 %s2468_s20, 10 }
 0x12e   : > { %s3072_s30 = scalar_lea.vmem [#allocation9], %s1649_s24  ;;  %s3075_s10 = scalar_lea.vmem [#allocation10], %s1649_s24 }
 0x12f   : > { %s1333_s27 = sshll.u32 %s3075_s10, 4  ;;  %s1316_s13 = sshll.u32 %s3072_s30, 4  ;;  %s3100_s27 = int_to_ptr.vmem [resolvable:$true] %s1333_s27  ;;  %s3107_s13 = int_to_ptr.vmem [resolvable:$true] %s1316_s13 }
 0x130   : > { %s3296_s9 = sld [smem:[#allocation33_spill]]  ;;  %s1350_s2 = sshll.u32 %s592_s29, 4  ;;  %s3118_s2 = int_to_ptr.vmem [resolvable:$true] %s1350_s2 }
 0x131   : > { %s3297_s19 = sld [smem:[#allocation32_spill]]  ;;  %s3299_s29 = sld [smem:[#allocation34_spill]] }
 0x132   : > { %s3122_s12 = scalar_lea.sflag [#allocation11], %s511_s15  ;;  %s2322_s7 = scalar_lea.vmem %s3100_s27, 1024 }
 0x133   : > { %p2323_p0 = scmp.ne.s32.totalorder %s3100_s27, %s2322_s7 }
 0x135   : > { %p2324_p5 = pnand %p2323_p0, %p3295_p10 }
 0x136   : > { %s3096_s0 = scalar_lea.hbm %s3296_s9, %s1727_s25 }
 0x137   : > { %s3298_s14 = smov %s3297_s19  ;;  %s3105_s16 = scalar_lea.hbm %s3297_s19, %s1727_s25 }
 0x138   : > { %s3116_s4 = scalar_lea.hbm %s3299_s29, %s1689_s28  ;;  %p2325_p3 = pneg %p2324_p5 }
 0x139   : > { %s2485_s25 = smov [#allocation10]  }
 0x13a   : > { %s2326_s11 = sshll.u32 %s2485_s25, 4  ;;  %s2327_s11 = int_to_ptr.vmem [resolvable:$false] %s2326_s11 }
 0x13b   : > { %p2329_p6 = scmp.lt.s32.totalorder %s3100_s27, %s2327_s11 }
 0x159   : > { %v1962_v28 = vpop.trf.xlu0 }
 0x15a   : > { %v1966_v1 = vunpack.i.h.bf16 %v1962_v28  ;;  %v1963_v19 = vunpack.i.l.bf16 %v1962_v28 }
 0x15d   : > { %v1967_v54 = vpop.trf.xlu0 }
 0x15e   : > { %v1971_v34 = vunpack.i.h.bf16 %v1967_v54  ;;  %v1968_v39 = vunpack.i.l.bf16 %v1967_v54 }
 0x160   : > { %v1732_v12 = vpack.c.bf16 %v1971_v34, %v1966_v1  ;;  %v1772_v9 = vpack.c.bf16 %v1968_v39, %v1963_v19 }
 0x161   : > { %v1972_v40 = vpop.trf.xlu0 }
 0x162   : > { %1733 = vst [vmem:[%s3072_s30] sm:$0xff] %v1732_v12   ;;  %1773 = vst [vmem:[%s3075_s10] sm:$0xff] %v1772_v9   ;;  %v1976_v50 = vunpack.i.h.bf16 %v1972_v40  ;;  %v1973_v4 = vunpack.i.l.bf16 %v1972_v40 }
 0x165   : > { %v1977_v13 = vpop.trf.xlu0 }
 0x166   : > { %v1981_v23 = vunpack.i.h.bf16 %v1977_v13  ;;  %v1978_v31 = vunpack.i.l.bf16 %v1977_v13 }
 0x168   : > { %v1737_v62 = vpack.c.bf16 %v1981_v23, %v1976_v50  ;;  %v1777_v21 = vpack.c.bf16 %v1978_v31, %v1973_v4 }
 0x169   : > { %v1982_v14 = vpop.trf.xlu0 }
 0x16a   : > { %1809 = vst [vmem:[%s3072_s30 + $0x8] sm:$0xff] %v1737_v62   ;;  %1816 = vst [vmem:[%s3075_s10 + $0x8] sm:$0xff] %v1777_v21   ;;  %v1986_v16 = vunpack.i.h.bf16 %v1982_v14  ;;  %v1983_v17 = vunpack.i.l.bf16 %v1982_v14 }
 0x16d   : > { %v1987_v5 = vpop.trf.xlu0 }
 0x16e   : > { %v1991_v38 = vunpack.i.h.bf16 %v1987_v5  ;;  %v1988_v29 = vunpack.i.l.bf16 %v1987_v5 }
 0x170   : > { %v1742_v41 = vpack.c.bf16 %v1991_v38, %v1986_v16  ;;  %v1782_v18 = vpack.c.bf16 %v1988_v29, %v1983_v17 }
 0x171   : > { %v1992_v20 = vpop.trf.xlu0 }
 0x172   : > { %1810 = vst [vmem:[%s3072_s30 + $0x10] sm:$0xff] %v1742_v41   ;;  %1817 = vst [vmem:[%s3075_s10 + $0x10] sm:$0xff] %v1782_v18   ;;  %v1996_v8 = vunpack.i.h.bf16 %v1992_v20  ;;  %v1993_v10 = vunpack.i.l.bf16 %v1992_v20 }
 0x175   : > { %v1997_v48 = vpop.trf.xlu0 }
 0x176   : > { %v2001_v36 = vunpack.i.h.bf16 %v1997_v48  ;;  %v1998_v7 = vunpack.i.l.bf16 %v1997_v48 }
 0x178   : > { %v1747_v43 = vpack.c.bf16 %v2001_v36, %v1996_v8  ;;  %v1787_v15 = vpack.c.bf16 %v1998_v7, %v1993_v10 }
 0x179   : > { %v2002_v22 = vpop.trf.xlu0 }
 0x17a   : > { %1811 = vst [vmem:[%s3072_s30 + $0x18] sm:$0xff] %v1747_v43   ;;  %1818 = vst [vmem:[%s3075_s10 + $0x18] sm:$0xff] %v1787_v15   ;;  %v2006_v63 = vunpack.i.h.bf16 %v2002_v22  ;;  %v2003_v32 = vunpack.i.l.bf16 %v2002_v22 }
 0x17d   : > { %v2007_v26 = vpop.trf.xlu0 }
 0x17e   : > { %v2011_v47 = vunpack.i.h.bf16 %v2007_v26  ;;  %v2008_v24 = vunpack.i.l.bf16 %v2007_v26 }
 0x180   : > { %v1752_v27 = vpack.c.bf16 %v2011_v47, %v2006_v63  ;;  %v1792_v37 = vpack.c.bf16 %v2008_v24, %v2003_v32 }
 0x181   : > { %v2012_v46 = vpop.trf.xlu0 }
 0x182   : > { %1812 = vst [vmem:[%s3072_s30 + $0x20] sm:$0xff] %v1752_v27   ;;  %1819 = vst [vmem:[%s3075_s10 + $0x20] sm:$0xff] %v1792_v37   ;;  %v2016_v30 = vunpack.i.h.bf16 %v2012_v46  ;;  %v2013_v44 = vunpack.i.l.bf16 %v2012_v46 }
 0x185   : > { %v2017_v45 = vpop.trf.xlu0 }
 0x186   : > { %v2021_v42 = vunpack.i.h.bf16 %v2017_v45  ;;  %v2018_v49 = vunpack.i.l.bf16 %v2017_v45 }
 0x188   : > { %v1757_v56 = vpack.c.bf16 %v2021_v42, %v2016_v30  ;;  %v1797_v33 = vpack.c.bf16 %v2018_v49, %v2013_v44 }
 0x189   : > { %v2022_v58 = vpop.trf.xlu0 }
 0x18a   : > { %1813 = vst [vmem:[%s3072_s30 + $0x28] sm:$0xff] %v1757_v56   ;;  %1820 = vst [vmem:[%s3075_s10 + $0x28] sm:$0xff] %v1797_v33   ;;  %v2026_v52 = vunpack.i.h.bf16 %v2022_v58  ;;  %v2023_v60 = vunpack.i.l.bf16 %v2022_v58 }
 0x18d   : > { %v2027_v11 = vpop.trf.xlu0 }
 0x18e   : > { %v2031_v53 = vunpack.i.h.bf16 %v2027_v11  ;;  %v2028_v59 = vunpack.i.l.bf16 %v2027_v11 }
 0x190   : > { %v1762_v57 = vpack.c.bf16 %v2031_v53, %v2026_v52  ;;  %v1802_v61 = vpack.c.bf16 %v2028_v59, %v2023_v60 }
 0x191   : > { %v2032_v2 = vpop.trf.xlu0 }
 0x192   : > { %1814 = vst [vmem:[%s3072_s30 + $0x30] sm:$0xff] %v1762_v57   ;;  %1821 = vst [vmem:[%s3075_s10 + $0x30] sm:$0xff] %v1802_v61   ;;  %v2036_v0 = vunpack.i.h.bf16 %v2032_v2  ;;  %v2033_v25 = vunpack.i.l.bf16 %v2032_v2 }
 0x195   : > { %v2037_v35 = vpop.trf.xlu0 }
 0x196   : > { %v2041_v55 = vunpack.i.h.bf16 %v2037_v35  ;;  %v2038_v3 = vunpack.i.l.bf16 %v2037_v35 }
 0x198   : > { %v1767_v51 = vpack.c.bf16 %v2041_v55, %v2036_v0  ;;  %v1807_v6 = vpack.c.bf16 %v2038_v3, %v2033_v25 }
 0x19a   : > { %1815 = vst [vmem:[%s3072_s30 + $0x38] sm:$0xff] %v1767_v51   ;;  %1822 = vst [vmem:[%s3075_s10 + $0x38] sm:$0xff] %v1807_v6   ;;  %s2328_s30 = scalar_lea.vmem %s2327_s11, 2048 }
 0x19b   : > { %p2330_p7 = scmp.lt.s32.totalorder %s2328_s30, %s2322_s7 }
 0x19d   : > { %p2331_p9 = por %p2330_p7, %p2329_p6 }
 0x19f   : > { %p2332_p1 = pnand %p2331_p9, %p2325_p3 }
 0x1a1   : > { %2335 = shalt.err (!%p2332_p1)
}
 0x1a2   : > { %s2336_s20 = scalar_lea.hbm %s3096_s0, 1024  ;;  %s2340_s28 = scalar_lea.hbm %s3296_s9, 3072 }
 0x1a3   : > { %p2337_p4 = scmp.ne.s32.totalorder %s3096_s0, %s2336_s20  ;;  %p2341_p13 = scmp.lt.u32.totalorder %s3096_s0, %s3296_s9 }
 0x1a4   : > { %p2342_p8 = scmp.lt.u32.totalorder %s2340_s28, %s2336_s20  ;;  %p2344_p0 = scmp.lt.u32.totalorder %s2336_s20, %s3096_s0 }
 0x1a5   : > { %p2338_p2 = pnand %p2337_p4, %p3295_p10 }
 0x1a6   : > { %p2343_p12 = por %p2342_p8, %p2341_p13 }
 0x1a7   : > { %p2339_p11 = pneg %p2338_p2 }
 0x1a8   : > { %p2345_p5 = por %p2344_p0, %p2343_p12 }
 0x1aa   : > { %p2346_p3 = pnand %p2345_p5, %p2339_p11 }
 0x1ac   : > { %2349 = shalt.err (!%p2346_p3)
}
 0x1ad   : > { %s2486_s26 = smov 64   ;;  %s2487_s24 = smov 4  }
 0x1ae   : > { %1836 = dma.vmem_to_hbm [thread:$0]  (%p3295_p10), %s3100_s27, 1024, %s3096_s0, %s3122_s12, %s2486_s26, %s2486_s26, %s2487_s24  }
 0x1af   : > { %s1289_s7 = scalar_lea.sflag [#allocation4], %s2799_s8  ;;  %s2350_s25 = scalar_lea.vmem %s3107_s13, 1024 }
 0x1b0   : > { %p2351_p6 = scmp.ne.s32.totalorder %s3107_s13, %s2350_s25  ;;  %s2488_s11 = smov [#allocation9]  }
 0x1b1   : > { %s2354_s30 = sshll.u32 %s2488_s11, 4  ;;  %s2355_s30 = int_to_ptr.vmem [resolvable:$false] %s2354_s30 }
 0x1b2   : > { %p2352_p7 = pnand %p2351_p6, %p3295_p10  ;;  %s2356_s20 = scalar_lea.vmem %s2355_s30, 2048 }
 0x1b3   : > { %p2357_p1 = scmp.lt.s32.totalorder %s3107_s13, %s2355_s30  ;;  %p2358_p4 = scmp.lt.s32.totalorder %s2356_s20, %s2350_s25 }
 0x1b4   : > { %p2353_p9 = pneg %p2352_p7 }
 0x1b5   : > { %p2359_p2 = por %p2358_p4, %p2357_p1 }
 0x1b7   : > { %p2360_p11 = pnand %p2359_p2, %p2353_p9 }
 0x1b9   : > { %2363 = shalt.err (!%p2360_p11)
}
 0x1ba   : > { %s2364_s27 = scalar_lea.hbm %s3105_s16, 1024  ;;  %s2368_s15 = scalar_lea.hbm %s3298_s14, 3072 }
 0x1bb   : > { %p2365_p13 = scmp.ne.s32.totalorder %s3105_s16, %s2364_s27  ;;  %p2369_p0 = scmp.lt.u32.totalorder %s3105_s16, %s3298_s14 }
 0x1bc   : > { %p2370_p5 = scmp.lt.u32.totalorder %s2368_s15, %s2364_s27  ;;  %p2372_p6 = scmp.lt.u32.totalorder %s2364_s27, %s3105_s16 }
 0x1bd   : > { %p2366_p8 = pnand %p2365_p13, %p3295_p10 }
 0x1be   : > { %p2371_p3 = por %p2370_p5, %p2369_p0 }
 0x1bf   : > { %p2367_p12 = pneg %p2366_p8 }
 0x1c0   : > { %p2373_p7 = por %p2372_p6, %p2371_p3 }
 0x1c2   : > { %p2374_p9 = pnand %p2373_p7, %p2367_p12 }
 0x1c4   : > { %2377 = shalt.err (!%p2374_p9)
}
 0x1c5   : > { %1835 = dma.vmem_to_hbm [thread:$0]  (%p3295_p10), %s3107_s13, 1024, %s3105_s16, %s1289_s7, %s2486_s26, %s2486_s26, %s2487_s24  }
 0x1c6   : > { %s2378_s19 = scalar_lea.vmem %s3118_s2, 16  ;;  %s2489_s25 = smov [#allocation12]  }
 0x1c7   : > { %p2379_p1 = scmp.ne.s32.totalorder %s3118_s2, %s2378_s19  ;;  %s2382_s11 = sshll.u32 %s2489_s25, 4  ;;  %s2383_s11 = int_to_ptr.vmem [resolvable:$false] %s2382_s11 }
 0x1c8   : > { %s2384_s30 = scalar_lea.vmem %s2383_s11, 32  ;;  %p2385_p11 = scmp.lt.s32.totalorder %s3118_s2, %s2383_s11 }
 0x1c9   : > { %p2380_p4 = pnand %p2379_p1, %p3295_p10  ;;  %p2386_p13 = scmp.lt.s32.totalorder %s2384_s30, %s2378_s19 }
 0x1cb   : > { %p2381_p2 = pneg %p2380_p4  ;;  %p2387_p8 = por %p2386_p13, %p2385_p11 }
 0x1cd   : > { %p2388_p12 = pnand %p2387_p8, %p2381_p2 }
 0x1cf   : > { %2391 = shalt.err (!%p2388_p12)
}
 0x1d0   : > { %s2392_s8 = scalar_lea.hbm %s3116_s4, 16  ;;  %s2396_s26 = scalar_lea.hbm %s3299_s29, 48 }
 0x1d1   : > { %p2393_p0 = scmp.ne.s32.totalorder %s3116_s4, %s2392_s8  ;;  %p2397_p6 = scmp.lt.u32.totalorder %s3116_s4, %s3299_s29 }
 0x1d2   : > { %p2398_p7 = scmp.lt.u32.totalorder %s2396_s26, %s2392_s8  ;;  %p2400_p1 = scmp.lt.u32.totalorder %s2392_s8, %s3116_s4 }
 0x1d3   : > { %p2394_p5 = pnand %p2393_p0, %p3295_p10 }
 0x1d4   : > { %p2399_p9 = por %p2398_p7, %p2397_p6 }
 0x1d5   : > { %p2395_p3 = pneg %p2394_p5 }
 0x1d6   : > { %p2401_p4 = por %p2400_p1, %p2399_p9 }
 0x1d8   : > { %p2402_p2 = pnand %p2401_p4, %p2395_p3 }
 0x1da   : > { %2405 = shalt.err (!%p2402_p2)
}
 0x1db   : > { %1837 = dma.vmem_to_hbm [thread:$0]  (%p3295_p10), %s3118_s2, 16, %s3116_s4, %s3122_s12  }
 0x1dc PF: > { %s3300_s20 = sld [smem:[#allocation21_spill]]  ;;  %s3301_s27 = sld [smem:[#allocation24_spill]] }
 0x1dd   : > { %p1875_p11 = scmp.ge.s32.totalorder %s2476_s22, 2 }
 0x1e2   : > { %s1376_s0 = sand.u32 1, %s3300_s20   ;;  %p3302_p13 = scmp.ne.s32.totalorder %s3301_s27, 0 }
 0x1e3   : > { %s1377_s23 = scalar_lea.sflag [#allocation4], %s1376_s0 }
 0x1e4   : > { %p1858_p8 = pnand %p1875_p11, %p3302_p13 }
 0x1e6   : > { %2443 = dma.done.wait (!%p1858_p8), %s1377_s23, 1024  }
 0x1e7   : > { %2445 = vsyncadd (!%p1858_p8), %s1377_s23, 4294966272  ;;  %s3303_s15 = sadd.s32 4294967294, %s2476_s22  }
 0x1e8   : > { %s1385_s28 = sand.u32 1, %s3303_s15  }
 0x1e9   : > { %s1386_s10 = scalar_lea.sflag [#allocation11], %s1385_s28 }
 0x1ea   : > { %2447 = dma.done.wait (!%p1858_p8), %s1386_s10, 1040  }
 0x1eb   : > { %2449 = vsyncadd (!%p1858_p8), %s1386_s10, 4294966256  ;;  %s1403_s17 = scalar_lea.sflag [#allocation14], %s1376_s0 }
 0x1ec   : > { %2451 = dma.done.wait (!%p1858_p8), %s1403_s17, 16  }
 0x1ed   : > { %2453 = vsyncadd (!%p1858_p8), %s1403_s17, 4294967280  ;;  %s33_s22 = sadd.s32 1, %s2476_s22   ;;  %s3304_s2 = sld [smem:[#allocation22_spill]] }
 0x1ee   : > { %p30_p10 = scmp.ge.s32.totalorder %s33_s22, 5   ;;  %s3305_s19 = sld [smem:[#allocation26_spill]] }
 0x1ef   : > { %s3306_s4 = sld [smem:[#allocation25_spill]]  ;;  %s3307_s17 = smov %s2460_s18 }
 0x1f0   : > { %s3309_s20 = smov %s2472_s21  ;;  %32 = sbr.rel (!%p30_p10) target bundleno = 20 (0x14), region = 178 }
 0x1f3   : > { %s3308_s18 = smov %s3304_s2 }
 0x1f5   : > { %s3310_s21 = smov %s3306_s4 }
 0x1f7   :  { %1407 = vsyncpa [#allocation3], 1 }
 0x1f8   :  { %1409 = vsyncpa [#allocation3 + $0x1], 1 }
 0x1f9   :  { %1410 = vsyncpa [#allocation6], 1 }
 0x1fa   :  { %1411 = vsyncpa [#allocation4], 1 }
 0x1fb   :  { %1413 = vsyncpa [#allocation4 + $0x1], 1 }
 0x1fc   :  { %1414 = vsyncpa [#allocation11], 1 }
 0x1fd   :  { %1416 = vsyncpa [#allocation11 + $0x1], 1 }
 0x1fe   :  { %1417 = vsyncpa [#allocation14], 1 }
 0x1ff   :  { %1419 = vsyncpa [#allocation14 + $0x1], 1 }

</bundles_post_ra>
